<compile_context>
chip_gen: v7x
topology: tpu7x:2x2x1
jax: 0.10.0
libtpu: 0.0.40
codegen_flags: <defaults>
</compile_context>

<pallas_src>
import functools

import jax
import jax.numpy as jnp
from jax.experimental import pallas as pl
from jax.experimental.pallas import tpu as pltpu

_EPS = 1e-5                      # nn.BatchNorm1d default eps
_VMEM_LIMIT = 32 * 1024 * 1024   # explicit scoped-VMEM budget (safe on v5e/v6e/v7x)


# ---------------------------------------------------------------------------
# helpers
# ---------------------------------------------------------------------------
def _exchange(n, dtype):
    """n x n exchange (anti-identity) matrix built from 2-D iotas (in-kernel)."""
    r = jax.lax.broadcasted_iota(jnp.int32, (n, n), 0)
    c = jax.lax.broadcasted_iota(jnp.int32, (n, n), 1)
    return (r + c == n - 1).astype(dtype)


def _flip2d(x):
    """Exact flip of a 2-D block over both axes: J_L @ x @ J_D on the MXU."""
    L, D = x.shape
    jl = _exchange(L, x.dtype)
    jd = _exchange(D, x.dtype)
    hi = jax.lax.Precision.HIGHEST
    y = jnp.dot(jl, x, preferred_element_type=jnp.float32, precision=hi)
    return jnp.dot(y, jd, preferred_element_type=jnp.float32, precision=hi)


def _pick_row_tile(m, max_tile=512):
    """Largest row tile that divides m (multiples of 8, capped at max_tile)."""
    if m <= max_tile:
        return m
    t = max_tile - max_tile % 8
    while t >= 8:
        if m % t == 0:
            return t
        t -= 8
    return m  # fallback: single block (only for awkward row counts)


# ---------------------------------------------------------------------------
# Pass A: fused flip + "complex" elementwise attention.
# One (real, imag) batch pair per grid step; src is read exactly once and the
# flipped K is built in-register (never materialized in HBM).
# ---------------------------------------------------------------------------
def _attn_pair_kernel(scale_ref, src_ref, out_ref):
    scale = scale_ref[...]                 # (1, 1) -> broadcasts
    s_re = src_ref[0, 0]                   # (L, D)  q_re (== v_re == v_im)
    s_im = src_ref[1, 0]                   # (L, D)  q_im
    k_re = _flip2d(s_re)                   # torch.flip(K, dims=[1, 2]), real half
    k_im = _flip2d(s_im)                   # imag half

    as_re = scale * (s_re * k_re - s_im * k_im)
    as_im = scale * (s_re * k_im - s_im * k_re)   # minus: mirrors the reference code
    v = s_re                                       # v_re == v_im == v[:bs//2]
    out_ref[0, 0] = (as_re * v - as_im * v).astype(out_ref.dtype)
    out_ref[1, 0] = (as_re * v + as_im * v).astype(out_ref.dtype)


# ---------------------------------------------------------------------------
# Pass B: BN1-normalize (precomputed batch stats) + Linear-GELU-Linear + residual,
# tiled over the bs*L row axis with resident weights.  Emits per-tile
# sum / sum-of-squares so BN2 statistics are a tiny reduction afterwards
# (two-pass BatchNorm -> no monolithic VMEM-resident activation).
# ---------------------------------------------------------------------------
def _bn1_ffn_kernel(x_ref, scale1_ref, shift1_ref, w1_ref, b1_ref, w2_ref, b2_ref,
                    z_ref, psum_ref, psumsq_ref):
    xn = x_ref[...] * scale1_ref[...] + shift1_ref[...]            # (TM, D) f32
    a = xn.astype(w1_ref.dtype)
    hid = jnp.dot(a, w1_ref[...], preferred_element_type=jnp.float32) + b1_ref[...]
    hid = 0.5 * hid * (1.0 + jax.lax.erf(hid * (2.0 ** -0.5)))     # exact GELU
    y = jnp.dot(hid.astype(w2_ref.dtype), w2_ref[...],
                preferred_element_type=jnp.float32) + b2_ref[...]
    z = xn + y                                                     # residual
    z_ref[...] = z.astype(z_ref.dtype)
    psum_ref[0] = jnp.sum(z, axis=0, keepdims=True)
    psumsq_ref[0] = jnp.sum(z * z, axis=0, keepdims=True)


# ---------------------------------------------------------------------------
# Pass C: final BatchNorm affine (z * scale2 + shift2), tiled over rows.
# ---------------------------------------------------------------------------
def _bn2_kernel(z_ref, scale2_ref, shift2_ref, out_ref):
    out_ref[...] = (z_ref[...] * scale2_ref[...] + shift2_ref[...]).astype(out_ref.dtype)


# ---------------------------------------------------------------------------
# Wrapper
# ---------------------------------------------------------------------------
@functools.partial(jax.jit, static_argnames=("use_bf16_matmul",))
def tst_encoder_layer(src, params, use_bf16_matmul=False):
    bs, L, D = src.shape
    assert bs % 2 == 0, "batch must be even (real/imag halves)"
    half = bs // 2
    M = bs * L
    f32 = jnp.float32

    cparams = pltpu.CompilerParams(
        dimension_semantics=("parallel",),
        vmem_limit_bytes=_VMEM_LIMIT,
    )

    # ---- Pass A: fused flip + attention --------------------------------------
    scale = params["scale"].reshape(1, 1).astype(f32)
    src_pairs = src.reshape(2, half, L, D)                     # free (leading split)
    attn = pl.pallas_call(
        _attn_pair_kernel,
        out_shape=jax.ShapeDtypeStruct((2, half, L, D), src.dtype),
        grid=(half,),
        in_specs=[
            pl.BlockSpec((1, 1), lambda b: (0, 0)),            # scale (resident)
            pl.BlockSpec((2, 1, L, D), lambda b: (0, b, 0, 0)),  # one batch pair
        ],
        out_specs=pl.BlockSpec((2, 1, L, D), lambda b: (0, b, 0, 0)),
        compiler_params=cparams,
    )(scale, src_pairs)
    attn = attn.reshape(bs, L, D)                              # free (leading merge)

    # ---- glue: transpose(1,2).view(bs,-1,D), residual, BN1 batch statistics --
    # TODO(synk): this relayout needs a minor-dims reshape that Mosaic cannot be
    # relied on to lower for arbitrary (L, D); it is left to XLA, which fuses it
    # with the residual add and the BN1 reduction.
    src2 = jnp.swapaxes(attn, 1, 2).reshape(bs, L, D)
    x = (src + src2).astype(f32)
    mean1 = jnp.mean(x, axis=(0, 1))
    var1 = jnp.mean(jnp.square(x - mean1), axis=(0, 1))        # biased, as PyTorch
    g1 = params["g1"].astype(f32)
    be1 = params["be1"].astype(f32)
    scale1 = g1 * jax.lax.rsqrt(var1 + _EPS)
    shift1 = be1 - mean1 * scale1

    # ---- Pass B: BN1-normalize + FFN + residual + BN2 partial stats ----------
    w1 = params["w1"].astype(f32)
    w2 = params["w2"].astype(f32)
    b1 = params["b1"].reshape(1, -1).astype(f32)
    b2 = params["b2"].reshape(1, -1).astype(f32)
    if use_bf16_matmul:  # optional MXU-peak path (v6e/v7x); off for exact parity
        w1 = w1.astype(jnp.bfloat16)
        w2 = w2.astype(jnp.bfloat16)
    dff = w1.shape[1]

    tm = _pick_row_tile(M)
    nt = M // tm
    xf = x.reshape(M, D)                                       # free (leading merge)

    z, psum, psumsq = pl.pallas_call(
        _bn1_ffn_kernel,
        out_shape=(
            jax.ShapeDtypeStruct((M, D), f32),
            jax.ShapeDtypeStruct((nt, 1, D), f32),
            jax.ShapeDtypeStruct((nt, 1, D), f32),
        ),
        grid=(nt,),
        in_specs=[
            pl.BlockSpec((tm, D), lambda i: (i, 0)),    # streamed row tile
            pl.BlockSpec((1, D), lambda i: (0, 0)),     # scale1 (resident)
            pl.BlockSpec((1, D), lambda i: (0, 0)),     # shift1 (resident)
            pl.BlockSpec((D, dff), lambda i: (0, 0)),   # w1     (resident)
            pl.BlockSpec((1, dff), lambda i: (0, 0)),   # b1     (resident)
            pl.BlockSpec((dff, D), lambda i: (0, 0)),   # w2     (resident)
            pl.BlockSpec((1, D), lambda i: (0, 0)),     # b2     (resident)
        ],
        out_specs=(
            pl.BlockSpec((tm, D), lambda i: (i, 0)),
            pl.BlockSpec((1, 1, D), lambda i: (i, 0, 0)),
            pl.BlockSpec((1, 1, D), lambda i: (i, 0, 0)),
        ),
        compiler_params=cparams,
    )(xf, scale1.reshape(1, D), shift1.reshape(1, D), w1, b1, w2, b2)

    # ---- finalize BN2 batch statistics from per-tile partials (tiny) ---------
    mean2 = jnp.sum(psum, axis=(0, 1)) / M
    var2 = jnp.maximum(jnp.sum(psumsq, axis=(0, 1)) / M - jnp.square(mean2), 0.0)
    g2 = params["g2"].astype(f32)
    be2 = params["be2"].astype(f32)
    scale2 = g2 * jax.lax.rsqrt(var2 + _EPS)
    shift2 = be2 - mean2 * scale2

    # ---- Pass C: final BatchNorm affine ---------------------------------------
    out = pl.pallas_call(
        _bn2_kernel,
        out_shape=jax.ShapeDtypeStruct((M, D), src.dtype),
        grid=(nt,),
        in_specs=[
            pl.BlockSpec((tm, D), lambda i: (i, 0)),
            pl.BlockSpec((1, D), lambda i: (0, 0)),
            pl.BlockSpec((1, D), lambda i: (0, 0)),
        ],
        out_specs=pl.BlockSpec((tm, D), lambda i: (i, 0)),
        compiler_params=cparams,
    )(z, scale2.reshape(1, D), shift2.reshape(1, D))

    return out.reshape(bs, L, D)


# ---------------------------------------------------------------------------
# Pure-JAX reference mirroring the PyTorch forward (sanity check)
# ---------------------------------------------------------------------------
def reference(src, params):
    bs, L, D = src.shape
    half = bs // 2
    scale = params["scale"]
    k = jnp.flip(src, axis=(1, 2))
    q_re, q_im = src[:half], src[half:]
    k_re, k_im = k[:half], k[half:]
    v = src[:half]                                   # v_re == v_im
    as_re = scale * (q_re * k_re - q_im * k_im)
    as_im = scale * (q_re * k_im - q_im * k_re)
    out = jnp.concatenate([as_re * v - as_im * v, as_re * v + as_im * v], axis=0)
    src2 = jnp.swapaxes(out, 1, 2).reshape(bs, -1, D)

    def bn(t, g, b):
        m = t.mean(axis=(0, 1))
        var = jnp.mean((t - m) ** 2, axis=(0, 1))
        return (t - m) * jax.lax.rsqrt(var + _EPS) * g + b

    x = bn(src + src2, params["g1"], params["be1"])
    hid = x.reshape(bs * L, D) @ params["w1"] + params["b1"]
    hid = 0.5 * hid * (1.0 + jax.lax.erf(hid / jnp.sqrt(2.0)))
    y = (hid @ params["w2"] + params["b2"]).reshape(bs, L, D)
    return bn(x + y, params["g2"], params["be2"])


def make_params(key, d_model, n_heads, d_ff):
    head_dim = d_model // n_heads
    k1, k2, k3, k4 = jax.random.split(key, 4)
    lim1 = d_model ** -0.5
    lim2 = d_ff ** -0.5
    return {
        # _ScaledDotProductAttention.scale (lsa=False -> fixed value)
        "scale": jnp.float32(head_dim ** -0.5),
        # ff = Linear(d_model, d_ff) -> GELU -> Linear(d_ff, d_model)
        "w1": jax.random.uniform(k1, (d_model, d_ff), jnp.float32, -lim1, lim1),
        "b1": jax.random.uniform(k2, (d_ff,), jnp.float32, -lim1, lim1),
        "w2": jax.random.uniform(k3, (d_ff, d_model), jnp.float32, -lim2, lim2),
        "b2": jax.random.uniform(k4, (d_model,), jnp.float32, -lim2, lim2),
        # BatchNorm1d(d_model) affine params (PyTorch default init)
        "g1": jnp.ones((d_model,), jnp.float32),
        "be1": jnp.zeros((d_model,), jnp.float32),
        "g2": jnp.ones((d_model,), jnp.float32),
        "be2": jnp.zeros((d_model,), jnp.float32),
    }


if __name__ == "__main__":
    bs, seq_len, d_model, n_heads, d_ff = 4, 16, 32, 4, 64

    key = jax.random.PRNGKey(0)
    k_src, k_par = jax.random.split(key)
    src = jax.random.normal(k_src, (bs, seq_len, d_model), jnp.float32)
    params = make_params(k_par, d_model, n_heads, d_ff)

    out = tst_encoder_layer(src, params)
    out = jax.block_until_ready(out)

    ref = reference(src, params)
    assert out.shape == (bs, seq_len, d_model)
    assert jnp.allclose(out, ref, atol=2e-3, rtol=2e-3), "mismatch vs reference"

    print("KERNEL_OK")
</pallas_src>

<mosaic_0001>
module attributes {stable_mosaic.version = 11 : i64} {
  func.func @_attn_pair_kernel(%arg0: i32, %arg1: memref<1x1xf32, #tpu.memory_space<vmem>>, %arg2: memref<2x1x16x32xf32, #tpu.memory_space<vmem>>, %arg3: memref<2x1x16x32xf32, #tpu.memory_space<vmem>>) attributes {dimension_semantics = [#tpu.dimension_semantics<parallel>], iteration_bounds = array<i64: 2>, scalar_prefetch = 0 : i64, scratch_operands = 0 : i64, tpu.core_type = #tpu.core_type<tc>, window_params = [{pipeline_mode = #tpu.pipeline_mode<synchronous>, transform_indices = @transform_0, window_bounds = array<i64: 1, 1>}, {transform_indices = @transform_1, window_bounds = array<i64: 2, 1, 16, 32>}, {transform_indices = @transform_2, window_bounds = array<i64: 2, 1, 16, 32>}]} {
    %c0 = arith.constant 0 : index
    %c0_0 = arith.constant 0 : index
    %0 = vector.load %arg1[%c0, %c0_0] : memref<1x1xf32, #tpu.memory_space<vmem>>, vector<1x1xf32>
    %c0_1 = arith.constant 0 : index
    %c0_2 = arith.constant 0 : index
    %c0_3 = arith.constant 0 : index
    %c0_4 = arith.constant 0 : index
    %1 = vector.load %arg2[%c0_1, %c0_2, %c0_3, %c0_4] : memref<2x1x16x32xf32, #tpu.memory_space<vmem>>, vector<1x1x16x32xf32>
    %2 = vector.shape_cast %1 : vector<1x1x16x32xf32> to vector<16x32xf32>
    %c1 = arith.constant 1 : index
    %c0_5 = arith.constant 0 : index
    %c0_6 = arith.constant 0 : index
    %c0_7 = arith.constant 0 : index
    %3 = vector.load %arg2[%c1, %c0_5, %c0_6, %c0_7] : memref<2x1x16x32xf32, #tpu.memory_space<vmem>>, vector<1x1x16x32xf32>
    %4 = vector.shape_cast %3 : vector<1x1x16x32xf32> to vector<16x32xf32>
    %5 = tpu.iota {dimensions = array<i32: 0>} : vector<16x16xi32>
    %6 = tpu.iota {dimensions = array<i32: 1>} : vector<16x16xi32>
    %7 = arith.addi %5, %6 : vector<16x16xi32>
    %c15_i32 = arith.constant 15 : i32
    %8 = vector.broadcast %c15_i32 : i32 to vector<16x16xi32>
    %9 = arith.cmpi eq, %7, %8 : vector<16x16xi32>
    %10 = arith.extui %9 : vector<16x16xi1> to vector<16x16xi32>
    %11 = arith.sitofp %10 : vector<16x16xi32> to vector<16x16xf32>
    %12 = tpu.iota {dimensions = array<i32: 0>} : vector<32x32xi32>
    %13 = tpu.iota {dimensions = array<i32: 1>} : vector<32x32xi32>
    %14 = arith.addi %12, %13 : vector<32x32xi32>
    %c31_i32 = arith.constant 31 : i32
    %15 = vector.broadcast %c31_i32 : i32 to vector<32x32xi32>
    %16 = arith.cmpi eq, %14, %15 : vector<32x32xi32>
    %17 = arith.extui %16 : vector<32x32xi1> to vector<32x32xi32>
    %18 = arith.sitofp %17 : vector<32x32xi32> to vector<32x32xf32>
    %cst = arith.constant dense<0.000000e+00> : vector<16x32xf32>
    %19 = tpu.matmul %11, %2, %cst {dimension_numbers = #tpu.dot_dimension_numbers<[1], [0], [0], [1], [0, 0, 1, 1], [], []>, precision = #tpu.contract_precision<fp32>} : vector<16x16xf32>, vector<16x32xf32>, vector<16x32xf32> -> vector<16x32xf32>
    %cst_8 = arith.constant dense<0.000000e+00> : vector<16x32xf32>
    %20 = tpu.matmul %19, %18, %cst_8 {dimension_numbers = #tpu.dot_dimension_numbers<[1], [0], [0], [1], [0, 0, 1, 1], [], []>, precision = #tpu.contract_precision<fp32>} : vector<16x32xf32>, vector<32x32xf32>, vector<16x32xf32> -> vector<16x32xf32>
    %21 = tpu.iota {dimensions = array<i32: 0>} : vector<16x16xi32>
    %22 = tpu.iota {dimensions = array<i32: 1>} : vector<16x16xi32>
    %23 = arith.addi %21, %22 : vector<16x16xi32>
    %c15_i32_9 = arith.constant 15 : i32
    %24 = vector.broadcast %c15_i32_9 : i32 to vector<16x16xi32>
    %25 = arith.cmpi eq, %23, %24 : vector<16x16xi32>
    %26 = arith.extui %25 : vector<16x16xi1> to vector<16x16xi32>
    %27 = arith.sitofp %26 : vector<16x16xi32> to vector<16x16xf32>
    %28 = tpu.iota {dimensions = array<i32: 0>} : vector<32x32xi32>
    %29 = tpu.iota {dimensions = array<i32: 1>} : vector<32x32xi32>
    %30 = arith.addi %28, %29 : vector<32x32xi32>
    %c31_i32_10 = arith.constant 31 : i32
    %31 = vector.broadcast %c31_i32_10 : i32 to vector<32x32xi32>
    %32 = arith.cmpi eq, %30, %31 : vector<32x32xi32>
    %33 = arith.extui %32 : vector<32x32xi1> to vector<32x32xi32>
    %34 = arith.sitofp %33 : vector<32x32xi32> to vector<32x32xf32>
    %cst_11 = arith.constant dense<0.000000e+00> : vector<16x32xf32>
    %35 = tpu.matmul %27, %4, %cst_11 {dimension_numbers = #tpu.dot_dimension_numbers<[1], [0], [0], [1], [0, 0, 1, 1], [], []>, precision = #tpu.contract_precision<fp32>} : vector<16x16xf32>, vector<16x32xf32>, vector<16x32xf32> -> vector<16x32xf32>
    %cst_12 = arith.constant dense<0.000000e+00> : vector<16x32xf32>
    %36 = tpu.matmul %35, %34, %cst_12 {dimension_numbers = #tpu.dot_dimension_numbers<[1], [0], [0], [1], [0, 0, 1, 1], [], []>, precision = #tpu.contract_precision<fp32>} : vector<16x32xf32>, vector<32x32xf32>, vector<16x32xf32> -> vector<16x32xf32>
    %37 = arith.mulf %2, %20 : vector<16x32xf32>
    %38 = arith.mulf %4, %36 : vector<16x32xf32>
    %39 = arith.subf %37, %38 : vector<16x32xf32>
    %40 = vector.broadcast %0 : vector<1x1xf32> to vector<16x32xf32>
    %41 = arith.mulf %40, %39 : vector<16x32xf32>
    %42 = arith.mulf %2, %36 : vector<16x32xf32>
    %43 = arith.mulf %4, %20 : vector<16x32xf32>
    %44 = arith.subf %42, %43 : vector<16x32xf32>
    %45 = vector.broadcast %0 : vector<1x1xf32> to vector<16x32xf32>
    %46 = arith.mulf %45, %44 : vector<16x32xf32>
    %47 = arith.mulf %41, %2 : vector<16x32xf32>
    %48 = arith.mulf %46, %2 : vector<16x32xf32>
    %49 = arith.subf %47, %48 : vector<16x32xf32>
    %c0_13 = arith.constant 0 : index
    %c0_14 = arith.constant 0 : index
    %c0_15 = arith.constant 0 : index
    %c0_16 = arith.constant 0 : index
    %50 = vector.load %arg3[%c0_13, %c0_14, %c0_15, %c0_16] : memref<2x1x16x32xf32, #tpu.memory_space<vmem>>, vector<1x1x16x32xf32>
    %51 = vector.shape_cast %50 : vector<1x1x16x32xf32> to vector<16x32xf32>
    %52 = vector.shape_cast %49 : vector<16x32xf32> to vector<1x1x16x32xf32>
    tpu.vector_store %arg3[%c0_13, %c0_14, %c0_15, %c0_16], %52 {strides = array<i32>} : memref<2x1x16x32xf32, #tpu.memory_space<vmem>>, vector<1x1x16x32xf32>,
    %53 = arith.mulf %41, %2 : vector<16x32xf32>
    %54 = arith.mulf %46, %2 : vector<16x32xf32>
    %55 = arith.addf %53, %54 : vector<16x32xf32>
    %c1_17 = arith.constant 1 : index
    %c0_18 = arith.constant 0 : index
    %c0_19 = arith.constant 0 : index
    %c0_20 = arith.constant 0 : index
    %56 = vector.load %arg3[%c1_17, %c0_18, %c0_19, %c0_20] : memref<2x1x16x32xf32, #tpu.memory_space<vmem>>, vector<1x1x16x32xf32>
    %57 = vector.shape_cast %56 : vector<1x1x16x32xf32> to vector<16x32xf32>
    %58 = vector.shape_cast %55 : vector<16x32xf32> to vector<1x1x16x32xf32>
    tpu.vector_store %arg3[%c1_17, %c0_18, %c0_19, %c0_20], %58 {strides = array<i32>} : memref<2x1x16x32xf32, #tpu.memory_space<vmem>>, vector<1x1x16x32xf32>,
    return
  }
  func.func @transform_0(%arg0: i32) -> (i32, i32) {
    %c0_i32 = arith.constant 0 : i32
    %c0_i32_0 = arith.constant 0 : i32
    %c0_i32_1 = arith.constant 0 : i32
    return %c0_i32, %c0_i32_0 : i32, i32
  }
  func.func @transform_1(%arg0: i32) -> (i32, i32, i32, i32) {
    %c0_i32 = arith.constant 0 : i32
    %c0_i32_0 = arith.constant 0 : i32
    %c0_i32_1 = arith.constant 0 : i32
    %c0_i32_2 = arith.constant 0 : i32
    return %c0_i32, %arg0, %c0_i32_0, %c0_i32_1 : i32, i32, i32, i32
  }
  func.func @transform_2(%arg0: i32) -> (i32, i32, i32, i32) {
    %c0_i32 = arith.constant 0 : i32
    %c0_i32_0 = arith.constant 0 : i32
    %c0_i32_1 = arith.constant 0 : i32
    %c0_i32_2 = arith.constant 0 : i32
    return %c0_i32, %arg0, %c0_i32_0, %c0_i32_1 : i32, i32, i32, i32
  }
}

module attributes {stable_mosaic.version = 11 : i64} {
  func.func @_bn1_ffn_kernel(%arg0: i32, %arg1: memref<64x32xf32, #tpu.memory_space<vmem>>, %arg2: memref<1x32xf32, #tpu.memory_space<vmem>>, %arg3: memref<1x32xf32, #tpu.memory_space<vmem>>, %arg4: memref<32x64xf32, #tpu.memory_space<vmem>>, %arg5: memref<1x64xf32, #tpu.memory_space<vmem>>, %arg6: memref<64x32xf32, #tpu.memory_space<vmem>>, %arg7: memref<1x32xf32, #tpu.memory_space<vmem>>, %arg8: memref<64x32xf32, #tpu.memory_space<vmem>>, %arg9: memref<1x1x32xf32, #tpu.memory_space<vmem>>, %arg10: memref<1x1x32xf32, #tpu.memory_space<vmem>>) attributes {dimension_semantics = [#tpu.dimension_semantics<parallel>], iteration_bounds = array<i64: 1>, scalar_prefetch = 0 : i64, scratch_operands = 0 : i64, tpu.core_type = #tpu.core_type<tc>, window_params = [{transform_indices = @transform_0, window_bounds = array<i64: 64, 32>}, {pipeline_mode = #tpu.pipeline_mode<synchronous>, transform_indices = @transform_1, window_bounds = array<i64: 1, 32>}, {pipeline_mode = #tpu.pipeline_mode<synchronous>, transform_indices = @transform_2, window_bounds = array<i64: 1, 32>}, {pipeline_mode = #tpu.pipeline_mode<synchronous>, transform_indices = @transform_3, window_bounds = array<i64: 32, 64>}, {pipeline_mode = #tpu.pipeline_mode<synchronous>, transform_indices = @transform_4, window_bounds = array<i64: 1, 64>}, {pipeline_mode = #tpu.pipeline_mode<synchronous>, transform_indices = @transform_5, window_bounds = array<i64: 64, 32>}, {pipeline_mode = #tpu.pipeline_mode<synchronous>, transform_indices = @transform_6, window_bounds = array<i64: 1, 32>}, {transform_indices = @transform_7, window_bounds = array<i64: 64, 32>}, {transform_indices = @transform_8, window_bounds = array<i64: 1, 1, 32>}, {transform_indices = @transform_9, window_bounds = array<i64: 1, 1, 32>}]} {
    %c0 = arith.constant 0 : index
    %c0_0 = arith.constant 0 : index
    %0 = vector.load %arg1[%c0, %c0_0] : memref<64x32xf32, #tpu.memory_space<vmem>>, vector<64x32xf32>
    %c0_1 = arith.constant 0 : index
    %c0_2 = arith.constant 0 : index
    %1 = vector.load %arg2[%c0_1, %c0_2] : memref<1x32xf32, #tpu.memory_space<vmem>>, vector<1x32xf32>
    %2 = vector.broadcast %1 : vector<1x32xf32> to vector<64x32xf32>
    %3 = arith.mulf %0, %2 : vector<64x32xf32>
    %c0_3 = arith.constant 0 : index
    %c0_4 = arith.constant 0 : index
    %4 = vector.load %arg3[%c0_3, %c0_4] : memref<1x32xf32, #tpu.memory_space<vmem>>, vector<1x32xf32>
    %5 = vector.broadcast %4 : vector<1x32xf32> to vector<64x32xf32>
    %6 = arith.addf %3, %5 : vector<64x32xf32>
    %c0_5 = arith.constant 0 : index
    %c0_6 = arith.constant 0 : index
    %7 = vector.load %arg4[%c0_5, %c0_6] : memref<32x64xf32, #tpu.memory_space<vmem>>, vector<32x64xf32>
    %cst = arith.constant dense<0.000000e+00> : vector<64x64xf32>
    %8 = tpu.matmul %6, %7, %cst {dimension_numbers = #tpu.dot_dimension_numbers<[1], [0], [0], [1], [0, 0, 1, 1], [], []>} : vector<64x32xf32>, vector<32x64xf32>, vector<64x64xf32> -> vector<64x64xf32>
    %c0_7 = arith.constant 0 : index
    %c0_8 = arith.constant 0 : index
    %9 = vector.load %arg5[%c0_7, %c0_8] : memref<1x64xf32, #tpu.memory_space<vmem>>, vector<1x64xf32>
    %10 = vector.broadcast %9 : vector<1x64xf32> to vector<64x64xf32>
    %11 = arith.addf %8, %10 : vector<64x64xf32>
    %cst_9 = arith.constant 5.000000e-01 : f32
    %12 = vector.broadcast %cst_9 : f32 to vector<64x64xf32>
    %13 = arith.mulf %12, %11 : vector<64x64xf32>
    %cst_10 = arith.constant 0.707106769 : f32
    %14 = vector.broadcast %cst_10 : f32 to vector<64x64xf32>
    %15 = arith.mulf %11, %14 : vector<64x64xf32>
    %16 = math.erf %15 : vector<64x64xf32>
    %cst_11 = arith.constant 1.000000e+00 : f32
    %17 = vector.broadcast %cst_11 : f32 to vector<64x64xf32>
    %18 = arith.addf %17, %16 : vector<64x64xf32>
    %19 = arith.mulf %13, %18 : vector<64x64xf32>
    %c0_12 = arith.constant 0 : index
    %c0_13 = arith.constant 0 : index
    %20 = vector.load %arg6[%c0_12, %c0_13] : memref<64x32xf32, #tpu.memory_space<vmem>>, vector<64x32xf32>
    %cst_14 = arith.constant dense<0.000000e+00> : vector<64x32xf32>
    %21 = tpu.matmul %19, %20, %cst_14 {dimension_numbers = #tpu.dot_dimension_numbers<[1], [0], [0], [1], [0, 0, 1, 1], [], []>} : vector<64x64xf32>, vector<64x32xf32>, vector<64x32xf32> -> vector<64x32xf32>
    %c0_15 = arith.constant 0 : index
    %c0_16 = arith.constant 0 : index
    %22 = vector.load %arg7[%c0_15, %c0_16] : memref<1x32xf32, #tpu.memory_space<vmem>>, vector<1x32xf32>
    %23 = vector.broadcast %22 : vector<1x32xf32> to vector<64x32xf32>
    %24 = arith.addf %21, %23 : vector<64x32xf32>
    %25 = arith.addf %6, %24 : vector<64x32xf32>
    %c0_17 = arith.constant 0 : index
    %c0_18 = arith.constant 0 : index
    %26 = vector.load %arg8[%c0_17, %c0_18] : memref<64x32xf32, #tpu.memory_space<vmem>>, vector<64x32xf32>
    tpu.vector_store %arg8[%c0_17, %c0_18], %25 {strides = array<i32>} : memref<64x32xf32, #tpu.memory_space<vmem>>, vector<64x32xf32>,
    %cst_19 = arith.constant dense<0.000000e+00> : vector<32xf32>
    %27 = vector.multi_reduction <add>, %25, %cst_19 [0] : vector<64x32xf32> to vector<32xf32>
    %28 = vector.shape_cast %27 : vector<32xf32> to vector<1x32xf32>
    %c0_20 = arith.constant 0 : index
    %c0_21 = arith.constant 0 : index
    %c0_22 = arith.constant 0 : index
    %29 = vector.load %arg9[%c0_20, %c0_21, %c0_22] : memref<1x1x32xf32, #tpu.memory_space<vmem>>, vector<1x1x32xf32>
    %30 = vector.shape_cast %29 : vector<1x1x32xf32> to vector<1x32xf32>
    %31 = vector.shape_cast %28 : vector<1x32xf32> to vector<1x1x32xf32>
    tpu.vector_store %arg9[%c0_20, %c0_21, %c0_22], %31 {strides = array<i32>} : memref<1x1x32xf32, #tpu.memory_space<vmem>>, vector<1x1x32xf32>,
    %32 = arith.mulf %25, %25 : vector<64x32xf32>
    %cst_23 = arith.constant dense<0.000000e+00> : vector<32xf32>
    %33 = vector.multi_reduction <add>, %32, %cst_23 [0] : vector<64x32xf32> to vector<32xf32>
    %34 = vector.shape_cast %33 : vector<32xf32> to vector<1x32xf32>
    %c0_24 = arith.constant 0 : index
    %c0_25 = arith.constant 0 : index
    %c0_26 = arith.constant 0 : index
    %35 = vector.load %arg10[%c0_24, %c0_25, %c0_26] : memref<1x1x32xf32, #tpu.memory_space<vmem>>, vector<1x1x32xf32>
    %36 = vector.shape_cast %35 : vector<1x1x32xf32> to vector<1x32xf32>
    %37 = vector.shape_cast %34 : vector<1x32xf32> to vector<1x1x32xf32>
    tpu.vector_store %arg10[%c0_24, %c0_25, %c0_26], %37 {strides = array<i32>} : memref<1x1x32xf32, #tpu.memory_space<vmem>>, vector<1x1x32xf32>,
    return
  }
  func.func @transform_0(%arg0: i32) -> (i32, i32) {
    %c0_i32 = arith.constant 0 : i32
    %c0_i32_0 = arith.constant 0 : i32
    return %arg0, %c0_i32 : i32, i32
  }
  func.func @transform_1(%arg0: i32) -> (i32, i32) {
    %c0_i32 = arith.constant 0 : i32
    %c0_i32_0 = arith.constant 0 : i32
    %c0_i32_1 = arith.constant 0 : i32
    return %c0_i32, %c0_i32_0 : i32, i32
  }
  func.func @transform_2(%arg0: i32) -> (i32, i32) {
    %c0_i32 = arith.constant 0 : i32
    %c0_i32_0 = arith.constant 0 : i32
    %c0_i32_1 = arith.constant 0 : i32
    return %c0_i32, %c0_i32_0 : i32, i32
  }
  func.func @transform_3(%arg0: i32) -> (i32, i32) {
    %c0_i32 = arith.constant 0 : i32
    %c0_i32_0 = arith.constant 0 : i32
    %c0_i32_1 = arith.constant 0 : i32
    return %c0_i32, %c0_i32_0 : i32, i32
  }
  func.func @transform_4(%arg0: i32) -> (i32, i32) {
    %c0_i32 = arith.constant 0 : i32
    %c0_i32_0 = arith.constant 0 : i32
    %c0_i32_1 = arith.constant 0 : i32
    return %c0_i32, %c0_i32_0 : i32, i32
  }
  func.func @transform_5(%arg0: i32) -> (i32, i32) {
    %c0_i32 = arith.constant 0 : i32
    %c0_i32_0 = arith.constant 0 : i32
    %c0_i32_1 = arith.constant 0 : i32
    return %c0_i32, %c0_i32_0 : i32, i32
  }
  func.func @transform_6(%arg0: i32) -> (i32, i32) {
    %c0_i32 = arith.constant 0 : i32
    %c0_i32_0 = arith.constant 0 : i32
    %c0_i32_1 = arith.constant 0 : i32
    return %c0_i32, %c0_i32_0 : i32, i32
  }
  func.func @transform_7(%arg0: i32) -> (i32, i32) {
    %c0_i32 = arith.constant 0 : i32
    %c0_i32_0 = arith.constant 0 : i32
    return %arg0, %c0_i32 : i32, i32
  }
  func.func @transform_8(%arg0: i32) -> (i32, i32, i32) {
    %c0_i32 = arith.constant 0 : i32
    %c0_i32_0 = arith.constant 0 : i32
    %c0_i32_1 = arith.constant 0 : i32
    return %arg0, %c0_i32, %c0_i32_0 : i32, i32, i32
  }
  func.func @transform_9(%arg0: i32) -> (i32, i32, i32) {
    %c0_i32 = arith.constant 0 : i32
    %c0_i32_0 = arith.constant 0 : i32
    %c0_i32_1 = arith.constant 0 : i32
    return %arg0, %c0_i32, %c0_i32_0 : i32, i32, i32
  }
}

module attributes {stable_mosaic.version = 11 : i64} {
  func.func @_bn2_kernel(%arg0: i32, %arg1: memref<64x32xf32, #tpu.memory_space<vmem>>, %arg2: memref<1x32xf32, #tpu.memory_space<vmem>>, %arg3: memref<1x32xf32, #tpu.memory_space<vmem>>, %arg4: memref<64x32xf32, #tpu.memory_space<vmem>>) attributes {dimension_semantics = [#tpu.dimension_semantics<parallel>], iteration_bounds = array<i64: 1>, scalar_prefetch = 0 : i64, scratch_operands = 0 : i64, tpu.core_type = #tpu.core_type<tc>, window_params = [{transform_indices = @transform_0, window_bounds = array<i64: 64, 32>}, {pipeline_mode = #tpu.pipeline_mode<synchronous>, transform_indices = @transform_1, window_bounds = array<i64: 1, 32>}, {pipeline_mode = #tpu.pipeline_mode<synchronous>, transform_indices = @transform_2, window_bounds = array<i64: 1, 32>}, {transform_indices = @transform_3, window_bounds = array<i64: 64, 32>}]} {
    %c0 = arith.constant 0 : index
    %c0_0 = arith.constant 0 : index
    %0 = vector.load %arg1[%c0, %c0_0] : memref<64x32xf32, #tpu.memory_space<vmem>>, vector<64x32xf32>
    %c0_1 = arith.constant 0 : index
    %c0_2 = arith.constant 0 : index
    %1 = vector.load %arg2[%c0_1, %c0_2] : memref<1x32xf32, #tpu.memory_space<vmem>>, vector<1x32xf32>
    %2 = vector.broadcast %1 : vector<1x32xf32> to vector<64x32xf32>
    %3 = arith.mulf %0, %2 : vector<64x32xf32>
    %c0_3 = arith.constant 0 : index
    %c0_4 = arith.constant 0 : index
    %4 = vector.load %arg3[%c0_3, %c0_4] : memref<1x32xf32, #tpu.memory_space<vmem>>, vector<1x32xf32>
    %5 = vector.broadcast %4 : vector<1x32xf32> to vector<64x32xf32>
    %6 = arith.addf %3, %5 : vector<64x32xf32>
    %c0_5 = arith.constant 0 : index
    %c0_6 = arith.constant 0 : index
    %7 = vector.load %arg4[%c0_5, %c0_6] : memref<64x32xf32, #tpu.memory_space<vmem>>, vector<64x32xf32>
    tpu.vector_store %arg4[%c0_5, %c0_6], %6 {strides = array<i32>} : memref<64x32xf32, #tpu.memory_space<vmem>>, vector<64x32xf32>,
    return
  }
  func.func @transform_0(%arg0: i32) -> (i32, i32) {
    %c0_i32 = arith.constant 0 : i32
    %c0_i32_0 = arith.constant 0 : i32
    return %arg0, %c0_i32 : i32, i32
  }
  func.func @transform_1(%arg0: i32) -> (i32, i32) {
    %c0_i32 = arith.constant 0 : i32
    %c0_i32_0 = arith.constant 0 : i32
    %c0_i32_1 = arith.constant 0 : i32
    return %c0_i32, %c0_i32_0 : i32, i32
  }
  func.func @transform_2(%arg0: i32) -> (i32, i32) {
    %c0_i32 = arith.constant 0 : i32
    %c0_i32_0 = arith.constant 0 : i32
    %c0_i32_1 = arith.constant 0 : i32
    return %c0_i32, %c0_i32_0 : i32, i32
  }
  func.func @transform_3(%arg0: i32) -> (i32, i32) {
    %c0_i32 = arith.constant 0 : i32
    %c0_i32_0 = arith.constant 0 : i32
    return %arg0, %c0_i32 : i32, i32
  }
}

</mosaic_0001>

<bundles_post_ra>
// kernel: tst_encoder_layer.5
= control target key start
LH: loop header
LB: loop body
LE: loop exit
PB: predicated region body
PF: predicated region fallthrough
CT: control target
= control target key end

     0   :  { %vm53_vm0 = vcmask 261120   ;;  %s180_s0 = inlined_call_operand.vmem [shape: f32[64,32], index: 0, kind: input, shape index: {}]   ;;  %s181_s1 = inlined_call_operand.vmem [shape: f32[1,32], index: 1, kind: input, shape index: {}]   ;;  %s182_s2 = inlined_call_operand.vmem [shape: f32[1,32], index: 2, kind: input, shape index: {}]   ;;  %s183_s3 = inlined_call_operand.hbm [shape: f32[64,32], index: 3, kind: output, shape index: {}]  }
   0x1   :  { %v15_v0 = vld [vmem:[%s180_s0] sm:$0xff]  ;;  %v16_v4 = vld [vmem:[%s180_s0 + $0x8] sm:$0xff]  ;;  %v17_v5 = vld [vmem:[%s180_s0 + $0x10] sm:$0xff] }
   0x2   :  { %v78_v1 = vld [vmem:[%s181_s1] ss:$0 sm:$0xff]  ;;  %v18_v6 = vld [vmem:[%s180_s0 + $0x18] sm:$0xff]  ;;  %v20_v11 = vld [vmem:[%s180_s0 + $0x28] sm:$0xff] }
   0x3   :  { %v79_v2 = vld [vmem:[%s182_s2] ss:$0 sm:$0xff]  ;;  %v30_v3 = vmul.f32 %v78_v1, %v15_v0  ;;  %v31_v7 = vmul.f32 %v78_v1, %v16_v4  ;;  %v32_v8 = vmul.f32 %v78_v1, %v17_v5  ;;  %v33_v9 = vmul.f32 %v78_v1, %v18_v6  ;;  %v21_v12 = vld [vmem:[%s180_s0 + $0x30] sm:$0xff]  ;;  %v22_v17 = vld [vmem:[%s180_s0 + $0x38] sm:$0xff] }
   0x4   :  { %v19_v10 = vld [vmem:[%s180_s0 + $0x20] sm:$0xff]  ;;  %v35_v15 = vmul.f32 %v78_v1, %v20_v11  ;;  %v36_v16 = vmul.f32 %v78_v1, %v21_v12 }
   0x5   :  { %v45_v13 = vadd.f32 %v79_v2, %v30_v3  ;;  %v34_v14 = vmul.f32 %v78_v1, %v19_v10 }
   0x6   :  { %8 = vsyncpa [#allocation3], 0  ;;  %s107_s30 = smov [#allocation2]   ;;  %v46_v18 = vadd.f32 %v79_v2, %v31_v7  ;;  %v47_v19 = vadd.f32 %v79_v2, %v32_v8  ;;  %v48_v20 = vadd.f32 %v79_v2, %v33_v9  ;;  %v37_v21 = vmul.f32 %v78_v1, %v22_v17 }
   0x7   :  { %s67_s4 = sshll.u32 %s107_s30, 4  ;;  %54 = vst.msk [vmem:[#allocation2] sm:$0xff] %vm53_vm0, %v45_v13  ;;  %v49_v22 = vadd.f32 %v79_v2, %v34_v14  ;;  %v50_v23 = vadd.f32 %v79_v2, %v35_v15  ;;  %v51_v24 = vadd.f32 %v79_v2, %v36_v16  ;;  %s68_s4 = int_to_ptr.vmem [resolvable:$true] %s67_s4 }
   0x8   :  { %55 = vst.msk [vmem:[#allocation2 + $0x8] sm:$0xff] %vm53_vm0, %v46_v18  ;;  %56 = vst.msk [vmem:[#allocation2 + $0x10] sm:$0xff] %vm53_vm0, %v47_v19  ;;  %v52_v25 = vadd.f32 %v79_v2, %v37_v21  ;;  %s83_s0 = scalar_lea.vmem %s68_s4, 1024  ;;  %p88_p1 = scmp.lt.s32.totalorder %s68_s4, %s68_s4 }
   0x9   :  { %57 = vst.msk [vmem:[#allocation2 + $0x18] sm:$0xff] %vm53_vm0, %v48_v20  ;;  %58 = vst.msk [vmem:[#allocation2 + $0x20] sm:$0xff] %vm53_vm0, %v49_v22  ;;  %p84_p0 = scmp.ne.s32.totalorder %s68_s4, %s83_s0  ;;  %p89_p2 = scmp.lt.s32.totalorder %s83_s0, %s83_s0 }
   0xa   :  { %59 = vst.msk [vmem:[#allocation2 + $0x28] sm:$0xff] %vm53_vm0, %v50_v23  ;;  %60 = vst.msk [vmem:[#allocation2 + $0x30] sm:$0xff] %vm53_vm0, %v51_v24 }
   0xb   :  { %61 = vst.msk [vmem:[#allocation2 + $0x38] sm:$0xff] %vm53_vm0, %v52_v25  ;;  %p90_p3 = por %p89_p2, %p88_p1 }
   0xd   :  { %p91_p4 = pnand %p90_p3, %p84_p0 }
   0xf   :  { %94 = shalt.err (!%p91_p4)
}
  0x10   :  { %s95_s7 = scalar_lea.hbm %s183_s3, 1024 }
  0x11   :  { %p96_p5 = scmp.ne.s32.totalorder %s183_s3, %s95_s7  ;;  %p99_p6 = scmp.lt.u32.totalorder %s95_s7, %s183_s3 }
  0x13   :  { %p101_p7 = pnand %p99_p6, %p96_p5 }
  0x15   :  { %104 = shalt.err (!%p101_p7)
}
  0x16   :  { %s108_s12 = smov 128   ;;  %s109_s13 = smov 8  }
  0x17   :  { %73 = dma.vmem_to_hbm [thread:$0]  %s68_s4, 1024, %s183_s3, [#allocation3], %s108_s12, %s108_s12, %s109_s13  }
  0x18   :  { %105 = dma.done.wait [#allocation3], 1024  }
  0x19   :  { %106 = vsyncadd [#allocation3], 4294966272 }
  0x1a   :  { %77 = vsyncpa [#allocation3], 1 }

// kernel: tst_encoder_layer.4
= control target key start
LH: loop header
LB: loop body
LE: loop exit
PB: predicated region body
PF: predicated region fallthrough
CT: control target
= control target key end

     0   :  { %vm78_vm0 = vcmask 261120   ;;  %vm263_vm1 = vcmask 523264   ;;  %vm430_vm2 = vcmask 253952   ;;  %s842_s3 = inlined_call_operand.vmem [shape: f32[32,64], index: 3, kind: input, shape index: {}]   ;;  %s843_s0 = inlined_call_operand.vmem [shape: f32[64,32], index: 0, kind: input, shape index: {}]   ;;  %s844_s1 = inlined_call_operand.vmem [shape: f32[1,32], index: 1, kind: input, shape index: {}]   ;;  %s845_s2 = inlined_call_operand.vmem [shape: f32[1,32], index: 2, kind: input, shape index: {}]   ;;  %s846_s5 = inlined_call_operand.vmem [shape: f32[64,32], index: 5, kind: input, shape index: {}]   ;;  %s847_s4 = inlined_call_operand.vmem [shape: f32[1,64], index: 4, kind: input, shape index: {}]   ;;  %s848_s6 = inlined_call_operand.vmem [shape: f32[1,32], index: 6, kind: input, shape index: {}]   ;;  %s849_s7 = inlined_call_operand.vmem [shape: f32[64,32], index: 7, kind: output, shape index: {0}]   ;;  %s850_s8 = inlined_call_operand.vmem [shape: f32[1,1,32], index: 8, kind: output, shape index: {1}]   ;;  %s851_s9 = inlined_call_operand.vmem [shape: f32[1,1,32], index: 9, kind: output, shape index: {2}]  }
   0x1   :  { %v67_v0 = vld [vmem:[%s842_s3] sm:$0xff]  ;;  %v68_v1 = vld [vmem:[%s842_s3 + $0x8] sm:$0xff]  ;;  %v69_v2 = vld [vmem:[%s842_s3 + $0x10] sm:$0xff] }
   0x2   :  { %v570_v3 = vpack.c.bf16 %v68_v1, %v67_v0  ;;  %v70_v4 = vld [vmem:[%s842_s3 + $0x18] sm:$0xff]  ;;  %v29_v5 = vld [vmem:[%s843_s0] sm:$0xff]  ;;  %v30_v10 = vld [vmem:[%s843_s0 + $0x8] sm:$0xff] }
   0x3   :  { %v474_v6 = vld [vmem:[%s844_s1] ss:$0 sm:$0xff]  ;;  %v574_v7 = vpack.c.bf16 %v70_v4, %v69_v2  ;;  %v31_v11 = vld [vmem:[%s843_s0 + $0x10] sm:$0xff]  ;;  %v32_v15 = vld [vmem:[%s843_s0 + $0x18] sm:$0xff] }
   0x4   :  { %v44_v8 = vmul.f32 %v474_v6, %v29_v5  ;;  %v475_v9 = vld [vmem:[%s845_s2] ss:$0 sm:$0xff]  ;;  %571 = vmatprep.subr.bf16.mxu0 %v570_v3  ;;  %v45_v12 = vmul.f32 %v474_v6, %v30_v10  ;;  %v46_v14 = vmul.f32 %v474_v6, %v31_v11  ;;  %v47_v18 = vmul.f32 %v474_v6, %v32_v15  ;;  %v34_v21 = vld [vmem:[%s843_s0 + $0x28] sm:$0xff]  ;;  %v35_v22 = vld [vmem:[%s843_s0 + $0x30] sm:$0xff] }
   0x5   :  { %573 = vmatpush3.bf16.msra.mxu0 %v570_v3  ;;  %v33_v16 = vld [vmem:[%s843_s0 + $0x20] sm:$0xff]  ;;  %v49_v24 = vmul.f32 %v474_v6, %v34_v21  ;;  %v50_v26 = vmul.f32 %v474_v6, %v35_v22  ;;  %v36_v27 = vld [vmem:[%s843_s0 + $0x38] sm:$0xff]  ;;  %v249_v33 = vld [vmem:[%s846_s5 + $0x8] sm:$0xff] }
   0x6   :  { %v695_v13 = vadd.f32 %v475_v9, %v44_v8  ;;  %575 = vmatprep.subr.bf16.mxu0 %v574_v7  ;;  %v705_v17 = vadd.f32 %v475_v9, %v45_v12  ;;  %v707_v19 = vadd.f32 %v475_v9, %v46_v14  ;;  %v48_v20 = vmul.f32 %v474_v6, %v33_v16  ;;  %v248_v32 = vld [vmem:[%s846_s5] sm:$0xff]  ;;  %v250_v35 = vld [vmem:[%s846_s5 + $0x10] sm:$0xff]  ;;  %v251_v36 = vld [vmem:[%s846_s5 + $0x18] sm:$0xff] }
   0x7   :  { %v717_v23 = vadd.f32 %v475_v9, %v47_v18  ;;  %v728_v28 = vadd.f32 %v475_v9, %v49_v24  ;;  %v51_v29 = vmul.f32 %v474_v6, %v36_v27  ;;  %v732_v30 = vadd.f32 %v475_v9, %v50_v26  ;;  %v252_v38 = vld [vmem:[%s846_s5 + $0x20] sm:$0xff]  ;;  %v253_v39 = vld [vmem:[%s846_s5 + $0x28] sm:$0xff]  ;;  %v254_v41 = vld [vmem:[%s846_s5 + $0x30] sm:$0xff] }
   0x8   :  { %530 = vmatprep.mubr.msk.f32.mxu0 %vm78_vm0, %v695_v13  ;;  %v721_v25 = vadd.f32 %v475_v9, %v48_v20  ;;  %v578_v34 = vpack.c.bf16 %v249_v33, %v248_v32  ;;  %v582_v37 = vpack.c.bf16 %v251_v36, %v250_v35  ;;  %v586_v40 = vpack.c.bf16 %v253_v39, %v252_v38  ;;  %v255_v42 = vld [vmem:[%s846_s5 + $0x38] sm:$0xff]  ;;  %v476_v44 = vld [vmem:[%s847_s4] ss:$0 sm:$0xff] }
   0x9   :  { %577 = vmatpush3.bf16.msra.mxu0 %v574_v7  ;;  %v736_v31 = vadd.f32 %v475_v9, %v51_v29  ;;  %v590_v43 = vpack.c.bf16 %v255_v42, %v254_v41 }
   0xa   :  { %579 = vmatprep.subr.bf16.mxu0 %v578_v34  ;;  %594 = vmatprep.subr.bf16.mxu1 %v578_v34 }
   0xb   :  { %598 = vmatpush3.bf16.msra.mxu1 %v578_v34 }
   0xc   :  { %531 = vmatmul.mubr.msk.f32.vlgmr.msra.gmra.mrb[0].mxu0 %vm78_vm0, %v705_v17  ;;  %595 = vmatprep.subr.bf16.mxu1 %v582_v37 }
   0xd   :  { %533 = vmatprep.mubr.msk.f32.mxu0 %vm78_vm0, %v707_v19  ;;  %581 = vmatpush3.bf16.msra.mxu0 %v578_v34 }
   0xe   :  { %583 = vmatprep.subr.bf16.mxu0 %v582_v37 }
   0xf   :  { %599 = vmatpush3.bf16.msra.mxu1 %v582_v37 }
  0x10   :  { %534 = vmatmul.mubr.msk.f32.gmra.mrb[2].mxu0 %vm78_vm0, %v717_v23  ;;  %596 = vmatprep.subr.bf16.mxu1 %v586_v40 }
  0x11   :  { %536 = vmatprep.mubr.msk.f32.mxu0 %vm78_vm0, %v721_v25  ;;  %585 = vmatpush3.bf16.msra.mxu0 %v582_v37 }
  0x12   :  { %587 = vmatprep.subr.bf16.mxu0 %v586_v40 }
  0x13   :  { %600 = vmatpush3.bf16.msra.mxu1 %v586_v40 }
  0x14   :  { %537 = vmatmul.mubr.msk.f32.gmra.mrb[4].mxu0 %vm78_vm0, %v728_v28  ;;  %597 = vmatprep.subr.bf16.mxu1 %v590_v43 }
  0x15   :  { %539 = vmatprep.mubr.msk.f32.mxu0 %vm78_vm0, %v732_v30  ;;  %589 = vmatpush3.bf16.msra.mxu0 %v586_v40 }
  0x16   :  { %591 = vmatprep.subr.bf16.mxu0 %v590_v43 }
  0x17   :  { %601 = vmatpush3.bf16.msra.mxu1 %v590_v43 }
  0x18   :  { %540 = vmatmul.mubr.msk.f32.gmra.mrb[6].mxu0 %vm78_vm0, %v736_v31 }
  0x19   :  { %593 = vmatpush3.bf16.msra.mxu0 %v590_v43 }
  0xdf   :  { %v532_v45 = vpop.f32.mrb[0].mxu0 }
  0xe0   :  { %v175_v46 = vadd.f32 %v532_v45, %v476_v44  ;;  %v169_v47 = vpop.f32.mrb[1].mxu0  ;;  %v485_v45 = vld [vmem:[%s848_s6] ss:$0 sm:$0xff] }
  0xe1   :  { %v170_v48 = vadd.f32 %v476_v44, %v169_v47 }
  0xe2   :  { %v217_v49 = vmul.f32 0.70710677, %v175_v46  ;;  %v209_v10 = vmul.f32 0.5, %v175_v46 }
  0xe3   :  { %v216_v50 = vmul.f32 0.70710677, %v170_v48  ;;  %v535_v51 = vpop.f32.mrb[2].mxu0  ;;  %v208_v8 = vmul.f32 0.5, %v170_v48 }
  0xe4   :  { %602 = verf.f32 %v217_v49  ;;  %v185_v52 = vadd.f32 %v535_v51, %v476_v44  ;;  %v179_v53 = vpop.f32.mrb[3].mxu0 }
  0xe5   :  { %604 = verf.f32 %v216_v50  ;;  %v180_v54 = vadd.f32 %v476_v44, %v179_v53 }
  0xe6   :  { %v219_v55 = vmul.f32 0.70710677, %v185_v52  ;;  %v211_v21 = vmul.f32 0.5, %v185_v52 }
  0xe7   :  { %v218_v56 = vmul.f32 0.70710677, %v180_v54  ;;  %v538_v57 = vpop.f32.mrb[4].mxu0  ;;  %v210_v18 = vmul.f32 0.5, %v180_v54 }
  0xe8   :  { %606 = verf.f32 %v219_v55  ;;  %v195_v58 = vadd.f32 %v538_v57, %v476_v44  ;;  %v189_v59 = vpop.f32.mrb[5].mxu0 }
  0xe9   :  { %608 = verf.f32 %v218_v56  ;;  %v190_v60 = vadd.f32 %v476_v44, %v189_v59 }
  0xea   :  { %v221_v61 = vmul.f32 0.70710677, %v195_v58  ;;  %v213_v34 = vmul.f32 0.5, %v195_v58 }
  0xeb   :  { %v220_v62 = vmul.f32 0.70710677, %v190_v60  ;;  %v541_v63 = vpop.f32.mrb[6].mxu0  ;;  %v212_v32 = vmul.f32 0.5, %v190_v60 }
  0xec   :  { %610 = verf.f32 %v221_v61  ;;  %v205_v0 = vadd.f32 %v541_v63, %v476_v44  ;;  %v199_v1 = vpop.f32.mrb[7].mxu0 }
  0xed   :  { %612 = verf.f32 %v220_v62  ;;  %v200_v2 = vadd.f32 %v476_v44, %v199_v1 }
  0xee   :  { %v603_v3 = vpop.eup %602  ;;  %v223_v4 = vmul.f32 0.70710677, %v205_v0  ;;  %v215_v42 = vmul.f32 0.5, %v205_v0 }
  0xef   :  { %v605_v5 = vpop.eup %604  ;;  %v233_v6 = vadd.f32 1.0, %v603_v3  ;;  %v222_v7 = vmul.f32 0.70710677, %v200_v2  ;;  %v214_v40 = vmul.f32 0.5, %v200_v2 }
  0xf0   :  { %v232_v9 = vadd.f32 1.0, %v605_v5  ;;  %614 = verf.f32 %v223_v4 }
  0xf1   :  { %616 = verf.f32 %v222_v7  ;;  %v241_v15 = vmul.f32 %v233_v6, %v209_v10 }
  0xf2   :  { %v607_v11 = vpop.eup %606  ;;  %v240_v12 = vmul.f32 %v232_v9, %v208_v8 }
  0xf3   :  { %v609_v14 = vpop.eup %608  ;;  %v235_v16 = vadd.f32 1.0, %v607_v11 }
  0xf4   :  { %558 = vmatprep.mubr.msk.f32.mxu0 %vm263_vm1, %v240_v12  ;;  %v234_v20 = vadd.f32 1.0, %v609_v14 }
  0xf5   :  { %559 = vmatmul.mubr.msk.f32.vlgmr.msra.gmra.mrb[8].mxu0 %vm263_vm1, %v241_v15  ;;  %v243_v27 = vmul.f32 %v235_v16, %v211_v21 }
  0xf6   :  { %v611_v22 = vpop.eup %610  ;;  %v242_v24 = vmul.f32 %v234_v20, %v210_v18 }
  0xf7   :  { %v613_v26 = vpop.eup %612  ;;  %v237_v29 = vadd.f32 1.0, %v611_v22 }
  0xf8   :  { %v236_v33 = vadd.f32 1.0, %v613_v26  ;;  %561 = vmatprep.mubr.msk.f32.mxu1 %vm263_vm1, %v242_v24 }
  0xf9   :  { %562 = vmatmul.mubr.msk.f32.vlgmr.msra.gmra.mrb[0].mxu1 %vm263_vm1, %v243_v27  ;;  %v245_v38 = vmul.f32 %v237_v29, %v213_v34 }
  0xfa   :  { %v615_v35 = vpop.eup %614  ;;  %v244_v36 = vmul.f32 %v236_v33, %v212_v32 }
  0xfb   :  { %v617_v37 = vpop.eup %616  ;;  %v239_v39 = vadd.f32 1.0, %v615_v35 }
  0xfc   :  { %v238_v41 = vadd.f32 1.0, %v617_v37  ;;  %564 = vmatprep.mubr.msk.f32.mxu1 %vm263_vm1, %v244_v36 }
  0xfd   :  { %565 = vmatmul.mubr.msk.f32.gmra.mrb[2].mxu1 %vm263_vm1, %v245_v38  ;;  %v247_v44 = vmul.f32 %v239_v39, %v215_v42 }
  0xfe   :  { %v246_v43 = vmul.f32 %v238_v41, %v214_v40 }
 0x100   :  { %567 = vmatprep.mubr.msk.f32.mxu1 %vm263_vm1, %v246_v43 }
 0x101   :  { %568 = vmatmul.mubr.msk.f32.gmra.mrb[4].mxu1 %vm263_vm1, %v247_v44 }
 0x1c8   :  { %v560_v46 = vpop.f32.mrb[8].mxu0 }
 0x1c9   :  { %v360_v47 = vadd.f32 %v560_v46, %v485_v45  ;;  %v354_v48 = vpop.f32.mrb[9].mxu0 }
 0x1ca   :  { %v355_v49 = vadd.f32 %v485_v45, %v354_v48 }
 0x1cb   :  { %v394_v50 = vadd.f32 %v360_v47, %v705_v17 }
 0x1cc   :  { %v393_v51 = vadd.f32 %v355_v49, %v695_v13  ;;  %v563_v52 = vpop.f32.mrb[0].mxu1 }
 0x1cd   :  { %402 = vst.msk [vmem:[%s849_s7 + $0x8] sm:$0xff] %vm78_vm0, %v394_v50  ;;  %v410_v53 = vsel %vm78_vm0, %v394_v50, 0.0  ;;  %v433_v54 = vmul.f32 %v394_v50, %v394_v50  ;;  %v370_v55 = vadd.f32 %v563_v52, %v485_v45  ;;  %v364_v56 = vpop.f32.mrb[1].mxu1 }
 0x1ce   :  { %401 = vst.msk [vmem:[%s849_s7] sm:$0xff] %vm78_vm0, %v393_v51  ;;  %v409_v17 = vsel %vm78_vm0, %v393_v51, 0.0  ;;  %v432_v57 = vmul.f32 %v393_v51, %v393_v51  ;;  %v365_v13 = vadd.f32 %v485_v45, %v364_v56 }
 0x1cf   :  { %v441_v58 = vsel %vm78_vm0, %v433_v54, 0.0  ;;  %v411_v59 = vadd.f32 %v410_v53, %v409_v17  ;;  %v396_v60 = vadd.f32 %v370_v55, %v717_v23 }
 0x1d0   :  { %v440_v61 = vsel %vm78_vm0, %v432_v57, 0.0  ;;  %v395_v62 = vadd.f32 %v365_v13, %v707_v19  ;;  %v566_v63 = vpop.f32.mrb[2].mxu1 }
 0x1d1   :  { %v442_v0 = vadd.f32 %v441_v58, %v440_v61  ;;  %404 = vst.msk [vmem:[%s849_s7 + $0x18] sm:$0xff] %vm78_vm0, %v396_v60  ;;  %v435_v1 = vmul.f32 %v396_v60, %v396_v60  ;;  %v380_v2 = vadd.f32 %v566_v63, %v485_v45  ;;  %v374_v3 = vpop.f32.mrb[3].mxu1  ;;  %v414_v7 = vsel %vm78_vm0, %v396_v60, 0.0 }
 0x1d2   :  { %403 = vst.msk [vmem:[%s849_s7 + $0x10] sm:$0xff] %vm78_vm0, %v395_v62  ;;  %v412_v23 = vsel %vm78_vm0, %v395_v62, 0.0  ;;  %v434_v4 = vmul.f32 %v395_v62, %v395_v62  ;;  %v375_v5 = vadd.f32 %v485_v45, %v374_v3 }
 0x1d3   :  { %v413_v19 = vadd.f32 %v412_v23, %v411_v59  ;;  %v398_v6 = vadd.f32 %v380_v2, %v728_v28  ;;  %v445_v11 = vsel %vm78_vm0, %v435_v1, 0.0 }
 0x1d4   :  { %v443_v8 = vsel %vm78_vm0, %v434_v4, 0.0  ;;  %v397_v9 = vadd.f32 %v375_v5, %v721_v25  ;;  %v569_v10 = vpop.f32.mrb[4].mxu1 }
 0x1d5   :  { %v444_v12 = vadd.f32 %v443_v8, %v442_v0  ;;  %406 = vst.msk [vmem:[%s849_s7 + $0x28] sm:$0xff] %vm78_vm0, %v398_v6  ;;  %v437_v14 = vmul.f32 %v398_v6, %v398_v6  ;;  %v415_v15 = vadd.f32 %v414_v7, %v413_v19  ;;  %v384_v16 = vpop.f32.mrb[5].mxu1  ;;  %v390_v18 = vadd.f32 %v569_v10, %v485_v45 }
 0x1d6   :  { %405 = vst.msk [vmem:[%s849_s7 + $0x20] sm:$0xff] %vm78_vm0, %v397_v9  ;;  %v416_v28 = vsel %vm78_vm0, %v397_v9, 0.0  ;;  %v436_v25 = vmul.f32 %v397_v9, %v397_v9  ;;  %v385_v20 = vadd.f32 %v485_v45, %v384_v16  ;;  %v418_v24 = vsel %vm78_vm0, %v398_v6, 0.0 }
 0x1d7   :  { %v417_v21 = vadd.f32 %v416_v28, %v415_v15  ;;  %v446_v22 = vadd.f32 %v445_v11, %v444_v12  ;;  %v400_v27 = vadd.f32 %v390_v18, %v736_v31  ;;  %v449_v34 = vsel %vm78_vm0, %v437_v14, 0.0 }
 0x1d8   :  { %v447_v26 = vsel %vm78_vm0, %v436_v25, 0.0  ;;  %v399_v29 = vadd.f32 %v385_v20, %v732_v30 }
 0x1d9   :  { %v448_v32 = vadd.f32 %v447_v26, %v446_v22  ;;  %v419_v33 = vadd.f32 %v418_v24, %v417_v21  ;;  %408 = vst.msk [vmem:[%s849_s7 + $0x38] sm:$0xff] %vm78_vm0, %v400_v27  ;;  %v439_v35 = vmul.f32 %v400_v27, %v400_v27  ;;  %v422_v38 = vsel %vm78_vm0, %v400_v27, 0.0 }
 0x1da   :  { %407 = vst.msk [vmem:[%s849_s7 + $0x30] sm:$0xff] %vm78_vm0, %v399_v29  ;;  %v420_v36 = vsel %vm78_vm0, %v399_v29, 0.0  ;;  %v438_v31 = vmul.f32 %v399_v29, %v399_v29 }
 0x1db   :  { %v421_v37 = vadd.f32 %v420_v36, %v419_v33  ;;  %v450_v30 = vadd.f32 %v449_v34, %v448_v32  ;;  %v453_v42 = vsel %vm78_vm0, %v439_v35, 0.0 }
 0x1dc   :  { %v451_v39 = vsel %vm78_vm0, %v438_v31, 0.0 }
 0x1dd   :  { %v423_v40 = vadd.f32 %v422_v38, %v421_v37  ;;  %v452_v41 = vadd.f32 %v451_v39, %v450_v30 }
 0x1df   :  { %v424_v43 = vrot.slane %v423_v40, 4  ;;  %v454_v44 = vadd.f32 %v453_v42, %v452_v41 }
 0x1e1   :  { %v425_v45 = vadd.f32 %v424_v43, %v423_v40  ;;  %v455_v46 = vrot.slane %v454_v44, 4 }
 0x1e3   :  { %v426_v47 = vrot.slane %v425_v45, 2  ;;  %v456_v48 = vadd.f32 %v455_v46, %v454_v44 }
 0x1e5   :  { %v427_v49 = vadd.f32 %v426_v47, %v425_v45  ;;  %v457_v50 = vrot.slane %v456_v48, 2 }
 0x1e7   :  { %v428_v51 = vrot.slane %v427_v49, 1  ;;  %v458_v52 = vadd.f32 %v457_v50, %v456_v48 }
 0x1e9   :  { %v429_v53 = vadd.f32 %v428_v51, %v427_v49  ;;  %v459_v54 = vrot.slane %v458_v52, 1 }
 0x1eb   :  { %431 = vst.msk [vmem:[%s850_s8] sm:$0x1] %vm430_vm2, %v429_v53  ;;  %v460_v55 = vadd.f32 %v459_v54, %v458_v52 }
 0x1ed   :  { %461 = vst.msk [vmem:[%s851_s9] sm:$0x1] %vm430_vm2, %v460_v55 }

// kernel: tst_encoder_layer.3
= control target key start
LH: loop header
LB: loop body
LE: loop exit
PB: predicated region body
PF: predicated region fallthrough
CT: control target
= control target key end

     0   :  { %s3499_s0 = inlined_call_operand.<no memory space> [shape: f32[1,1], index: 0, kind: input, shape index: {}]   ;;  %s3500_s1 = inlined_call_operand.hbm [shape: f32[2,2,16,32], index: 1, kind: input, shape index: {}]   ;;  %s3501_s2 = inlined_call_operand.vmem [shape: f32[2,2,16,32], index: 2, kind: output, shape index: {}]  }
   0x1   :  { %v7_v0 = vstv %s3499_s0 }
   0x2   :  { %8 = vst [vmem:[#allocation2] sm:$0x1] %v7_v0 }
   0x3   :  { %9 = vsyncpa [#allocation4], 0 }
   0x4   :  { %11 = vsyncpa [#allocation4 + $0x1], 0  ;;  %s3153_s11 = smov 0   ;;  %s3155_s12 = smov 0  }
   0x5   :  { %s3157_s13 = smov 0   ;;  %s3159_s14 = smov 0  }
   0x6 LB: > { %s3172_s0 = sadd.s32 4294967295, %s3124_s14   ;;  %s3175_s15 = sadd.s32 1, %s3124_s14   ;;  %s3124_s14 = sphi %s3159_s14, %s3512_s14   ;;  %s3120_s13 = sphi %s3157_s13, %s3511_s13   ;;  %s3116_s12 = sphi %s3155_s12, %s3510_s12   ;;  %s3112_s11 = sphi %s3153_s11, %s3509_s11  }
   0x7   : > { %s42_s16 = ssub.s32 %s3124_s14, %s3175_s15  ;;  %s45_s17 = sadd.s32 1, %s3120_s13 }
   0x8   : > { %p43_p0 = scmp.eq.s32.totalorder %s42_s16, 0  ;;  %p52_p1 = scmp.ne.s32.totalorder %s3120_s13, %s3116_s12 }
   0x9   : > { %p53_p2 = scmp.eq.s32.totalorder %s3124_s14, 0  ;;  %p58_p3 = scmp.ne.s32.totalorder %s3116_s12, %s3112_s11 }
   0xa   : > { %s3185_s18 = scalar_select %p43_p0, %s3120_s13, %s45_s17  }
   0xb   : > { %p3187_p4 = por %p53_p2, %p52_p1  ;;  %p59_p5 = scmp.eq.s32.totalorder %s3172_s0, 0 }
   0xc   : > { %p82_p6 = scmp.eq.s32.totalorder %s3172_s0, 1  ;;  %p2456_p9 = scmp.ge.s32.totalorder %s3124_s14, 2 }
   0xd   : > { %p3193_p7 = por %p59_p5, %p58_p3 }
   0xe   : > { %p3197_p8 = por %p82_p6, %p52_p1  ;;  %107 = sbr.rel (%p2456_p9) target bundleno = 34 (0x22), region = 20 }
  0x15   : > { %s111_s22 = sand.u32 1, %s3120_s13   ;;  %s2517_s23 = sshll.u32 %s3124_s14, 8 }
  0x16   : > { %s2457_s24 = sshll.u32 %s111_s22, 5  ;;  %s121_s27 = scalar_lea.hbm %s3500_s1, %s2517_s23 }
  0x17   : > { %s3039_s28 = scalar_select %p3187_p4, [#allocation0], [#allocation8] }
  0x18   : > { %s115_s29 = scalar_lea.vmem [#allocation3], %s2457_s24  ;;  %s3126_s4 = smov 512  }
  0x19   : > { %s134_s30 = sshll.u32 %s115_s29, 4  ;;  %s126_s3 = sld [smem:[%s3039_s28]]   ;;  %s135_s30 = int_to_ptr.vmem [resolvable:$true] %s134_s30 }
  0x1a   : > { %3040 = sst [smem:[#allocation7]] (%p3187_p4), %s3126_s4  ;;  %s3127_s5 = smov 256  }
  0x1b   : > { %3041 = sst [smem:[#allocation7 + $0x1]] (%p3187_p4), %s3127_s5  ;;  %s3128_s6 = smov 2  }
  0x1c   : > { %3042 = sst [smem:[#allocation7 + $0x2]] (%p3187_p4), %s3128_s6  ;;  %s3129_s7 = smov 128  }
  0x1d   : > { %3043 = sst [smem:[#allocation7 + $0x3]] (%p3187_p4), %s3129_s7  ;;  %s3130_s9 = smov 8  }
  0x1e   : > { %3044 = sst [smem:[#allocation7 + $0x4]] (%p3187_p4), %s3129_s7  ;;  %s112_s11 = scalar_lea.sflag [#allocation4], %s111_s22 }
  0x1f   : > { %s2460_s8 = sshll.u32 %s126_s3, 26  ;;  %3045 = sst [smem:[#allocation7 + $0x5]] (%p3187_p4), %s3130_s9 }
  0x20   : > { %s2461_s10 = sadd.s32 134217728, %s2460_s8  ;;  %s3131_s16 = smov [#allocation6]  }
  0x21   : > { %3046 = dma.general (%p3187_p4), %s121_s27, 512, %s135_s30, %s112_s11, %s3131_s16, [#allocation7], %s2461_s10, 0  }
  0x22 PF: > { %p2462_p10 = scmp.ge.s32.totalorder %s3124_s14, 1  ;;  %p155_p11 = scmp.lt.s32.totalorder %s3124_s14, 3 }
  0x24   : > { %p156_p12 = pnand %p2462_p10, %p155_p11 }
  0x25   : > { %s161_s17 = sand.u32 (!%p156_p12), 1, %s3116_s12  }
  0x26   : > { %159 = sbr.rel (%p156_p12) target bundleno = 628 (0x274), region = 28  ;;  %s3226_s23 = sshll.u32 (!%p156_p12), %s161_s17, 5 }
  0x27   : > { %s162_s24 = scalar_lea.sflag (!%p156_p12), [#allocation4], %s161_s17  ;;  %s3229_s25 = scalar_lea.vmem (!%p156_p12), [#allocation3], %s3226_s23 }
  0x2d   : > { %3107 = dma.done.wait (%p3193_p7), %s162_s24, 512  }
  0x2e   : > { %3109 = vsyncadd (%p3193_p7), %s162_s24, 4294966784  ;;  %v191_v1 = vlaneseq  ;;  %vm220_vm0 = vcmask 130048   ;;  %v3249_v7 = vld [vmem:[%s3229_s25] sm:$0xff]  ;;  %v3252_v8 = vld [vmem:[%s3229_s25 + $0x8] sm:$0xff]  ;;  %v3132_v9 = vmov 0.0   ;;  %vm729_vm9 = vcmask 261120  }
  0x2f   : > { %v228_v11 = vand.u32 4294901760, %v3249_v7  ;;  %v231_v12 = vand.u32 4294901760, %v3252_v8  ;;  %v3299_v37 = vld [vmem:[%s3229_s25 + $0x10] sm:$0xff]  ;;  %v3302_v38 = vld [vmem:[%s3229_s25 + $0x18] sm:$0xff]  ;;  %v3133_v61 = vmov 1.0|1.0  }
  0x30   : > { %v3235_v2 = vshrl.u32 %v191_v1, 7  ;;  %v3237_v3 = vand.u32 127, %v191_v1  ;;  %v1265_v39 = vand.u32 4294901760, %v3299_v37  ;;  %v1268_v40 = vand.u32 4294901760, %v3302_v38  ;;  %s184_s14 = scalar_lea.vmem [#allocation5], %s3226_s23  ;;  %s2518_s19 = sshll.u32 (%p3197_p8), %s3172_s0, 4 }
  0x31   : > { %v2855_v16 = vpack.c.bf16 %v231_v12, %v228_v11  ;;  %v316_v19 = vsub.f32 %v3249_v7, %v228_v11  ;;  %v323_v20 = vsub.f32 %v3252_v8, %v231_v12  ;;  %s2347_s26 = scalar_lea.vmem (%p3197_p8), %s3501_s2, %s2518_s19 }
  0x32   : > { %v3241_v4 = vadd.s32 %v3237_v3, %v3235_v2  ;;  %v193_v5 = vadd.s32 8, %v3235_v2  ;;  %v1353_v41 = vsub.f32 %v3299_v37, %v1265_v39  ;;  %v1360_v42 = vsub.f32 %v3302_v38, %v1268_v40 }
  0x33   : > { %2856 = vmatprep.subr.bf16.mxu0 %v2855_v16  ;;  %v317_v23 = vand.u32 4294901760, %v316_v19  ;;  %v324_v24 = vand.u32 4294901760, %v323_v20  ;;  %v2863_v35 = vpack.c.bf16 %v323_v20, %v316_v19  ;;  %v2927_v45 = vpack.c.bf16 %v1268_v40, %v1265_v39 }
  0x34   : > { %vm198_vm1 = vcmp.eq.s32.totalorder %v3241_v4, 15  ;;  %v3246_v6 = vadd.s32 %v3237_v3, %v193_v5  ;;  %vm208_vm3 = vcmp.eq.s32.totalorder %v3241_v4, 31  ;;  %2858 = vmatpush3.bf16.msra.mxu0 %v2855_v16  ;;  %v1354_v43 = vand.u32 4294901760, %v1353_v41 }
  0x35   : > { %v3255_v10 = vsel %vm198_vm1, 1.0, %v3132_v9  ;;  %v318_v27 = vsub.f32 %v316_v19, %v317_v23  ;;  %v325_v28 = vsub.f32 %v323_v20, %v324_v24  ;;  %v2871_v36 = vpack.c.bf16 %v324_v24, %v317_v23  ;;  %v2509_v24 = vld [vmem:[#allocation2] ss:$0 sm:$0xff] }
  0x36   : > { %v222_v13 = vsel %vm220_vm0, %v3255_v10, 0  ;;  %vm199_vm2 = vcmp.eq.s32.totalorder %v3246_v6, 15  ;;  %vm209_vm4 = vcmp.eq.s32.totalorder %v3246_v6, 31  ;;  %v1361_v44 = vand.u32 4294901760, %v1360_v42 }
  0x37   : > { %v3263_v14 = vsub.f32 %v222_v13, %v222_v13  ;;  %v3266_v15 = vsel %vm199_vm2, 1.0, %v3132_v9  ;;  %vm3275_vm5 = vmpackc.low %vm209_vm4, %vm208_vm3  ;;  %v319_v31 = vand.u32 4294901760, %v318_v27  ;;  %v326_v32 = vand.u32 4294901760, %v325_v28 }
  0x38   : > { %v225_v17 = vsel %vm220_vm0, %v3266_v15, 0  ;;  %v1355_v46 = vsub.f32 %v1353_v41, %v1354_v43  ;;  %v1362_v47 = vsub.f32 %v1360_v42, %v1361_v44  ;;  %v2935_v51 = vpack.c.bf16 %v1360_v42, %v1353_v41  ;;  %2880 = vmatprep.subr.msk.bf16.mxu1 %vm3275_vm5, %v3133_v61 }
  0x39   : > { %v3282_v21 = vand.u32 4294901760, %v3263_v14  ;;  %v3284_v22 = vsub.f32 %v225_v17, %v225_v17  ;;  %v2859_v34 = vpack.c.bf16 %v326_v32, %v319_v31  ;;  %v2943_v52 = vpack.c.bf16 %v1361_v44, %v1354_v43  ;;  %2882 = vmatpush3.bf16.msk.msra.mxu1 %vm3275_vm5, %v3133_v61 }
  0x3a   : > { %v1356_v48 = vand.u32 4294901760, %v1355_v46  ;;  %v1363_v49 = vand.u32 4294901760, %v1362_v47  ;;  %v204_v53 = vadd.s32 16, %v3235_v2  ;;  %v205_v54 = vadd.s32 24, %v3235_v2 }
  0x3b   : > { %v297_v25 = vsub.f32 %v3263_v14, %v3282_v21  ;;  %v3289_v26 = vand.u32 4294901760, %v3284_v22  ;;  %2860 = vmatprep.subr.bf16.mxu0 %v2859_v34  ;;  %v2469_v55 = vsel %vm208_vm3, 1.0, %v3132_v9  ;;  %v2470_v56 = vsel %vm209_vm4, 1.0, %v3132_v9 }
  0x3c   : > { %v2931_v50 = vpack.c.bf16 %v1363_v49, %v1356_v48  ;;  %v206_v57 = vadd.s32 %v204_v53, %v3237_v3  ;;  %v207_v58 = vadd.s32 %v205_v54, %v3237_v3  ;;  %v827_v59 = vsub.f32 %v2469_v55, %v2469_v55 }
  0x3d   : > { %v298_v29 = vand.u32 4294901760, %v297_v25  ;;  %v307_v30 = vsub.f32 %v3284_v22, %v3289_v26  ;;  %v834_v60 = vsub.f32 %v2470_v56, %v2470_v56  ;;  %v3134_v25 = vmov 0  }
  0x3e   : > { %vm210_vm6 = vcmp.eq.s32.totalorder %v206_v57, 31  ;;  %vm211_vm7 = vcmp.eq.s32.totalorder %v207_v58, 31  ;;  %v828_v62 = vand.u32 4294901760, %v827_v59  ;;  %3089 = vset.pattern.permute.xlu0 %v3134_v25 }
  0x3f   : > { %2643 = vmatprep.mubr.f32.mxu0 %v298_v29  ;;  %v308_v33 = vand.u32 4294901760, %v307_v30  ;;  %v835_v63 = vand.u32 4294901760, %v834_v60  ;;  %vm3354_vm8 = vmpackc.low %vm211_vm7, %vm210_vm6  ;;  %v2471_v3 = vsel %vm210_vm6, 1.0, %v3132_v9  ;;  %v2472_v4 = vsel %vm211_vm7, 1.0, %v3132_v9  ;;  %2312 = vperm.xlu0 %3089, %v2509_v24  }
  0x40   : > { %2884 = vmatprep.subr.msk.bf16.mxu1 %vm3354_vm8, %v3133_v61  ;;  %v829_v1 = vsub.f32 %v827_v59, %v828_v62  ;;  %v841_v5 = vsub.f32 %v2471_v3, %v2471_v3  ;;  %v848_v6 = vsub.f32 %v2472_v4, %v2472_v4  ;;  %v3380_v20 = vpack.c.bf16 %v834_v60, %v827_v59 }
  0x41   : > { %2644 = vmatmul.mubr.f32.vlgmr.msra.gmra.mrb[0].mxu0 %v308_v33  ;;  %v836_v2 = vsub.f32 %v834_v60, %v835_v63  ;;  %2886 = vmatpush3.bf16.msk.msra.mxu1 %vm3354_vm8, %v3133_v61 }
  0x42   : > { %2650 = vmatprep.mubr.msk.f32.mxu0 %vm220_vm0, %v3255_v10  ;;  %2862 = vmatpush3.bf16.msra.mxu0 %v2859_v34  ;;  %v842_v12 = vand.u32 4294901760, %v841_v5  ;;  %v849_v13 = vand.u32 4294901760, %v848_v6 }
  0x43   : > { %2864 = vmatprep.subr.bf16.mxu0 %v2863_v35  ;;  %v837_v11 = vand.u32 4294901760, %v836_v2 }
  0x44   : > { %v843_v9 = vsub.f32 %v841_v5, %v842_v12  ;;  %v3387_v23 = vpack.c.bf16 %v849_v13, %v842_v12 }
  0x49   : > { %2651 = vmatmul.mubr.msk.f32.vlgmr.msra.gmra.mrb[0].mxu0 %vm220_vm0, %v3266_v15 }
  0x4a   : > { %2866 = vmatpush3.bf16.msra.mxu0 %v2863_v35  ;;  %2657 = vmatprep.mubr.f32.mxu0 %v3263_v14 }
  0x4b   : > { %2868 = vmatprep.subr.bf16.mxu0 %v2855_v16 }
  0x51   : > { %2658 = vmatmul.mubr.f32.vlgmr.msra.gmra.mrb[0].mxu0 %v3284_v22 }
  0x52   : > { %2870 = vmatpush3.bf16.msra.mxu0 %v2855_v16  ;;  %2664 = vmatprep.mubr.f32.mxu0 %v3282_v21 }
  0x53   : > { %2872 = vmatprep.subr.bf16.mxu0 %v2871_v36 }
  0x59   : > { %2665 = vmatmul.mubr.f32.vlgmr.msra.gmra.mrb[0].mxu0 %v3289_v26 }
  0x5a   : > { %2874 = vmatpush3.bf16.msra.mxu0 %v2871_v36  ;;  %2671 = vmatprep.mubr.msk.f32.mxu0 %vm220_vm0, %v3255_v10 }
  0x5b   : > { %2876 = vmatprep.subr.bf16.mxu0 %v2855_v16 }
  0x61   : > { %2672 = vmatmul.mubr.msk.f32.vlgmr.msra.gmra.mrb[0].mxu0 %vm220_vm0, %v3266_v15 }
  0x62   : > { %2878 = vmatpush3.bf16.msra.mxu0 %v2855_v16  ;;  %2678 = vmatprep.mubr.msk.f32.mxu0 %vm220_vm0, %v3255_v10  ;;  %v844_v16 = vand.u32 4294901760, %v843_v9 }
  0x63   : > { %2928 = vmatprep.subr.bf16.mxu0 %v2927_v45 }
  0x69   : > { %2679 = vmatmul.mubr.msk.f32.vlgmr.msra.gmra.mrb[0].mxu0 %vm220_vm0, %v3266_v15 }
  0x6a   : > { %2930 = vmatpush3.bf16.msra.mxu0 %v2927_v45  ;;  %2751 = vmatprep.mubr.f32.mxu0 %v298_v29 }
  0x6b   : > { %2932 = vmatprep.subr.bf16.mxu0 %v2931_v50 }
  0x6d   : > { %2752 = vmatmul.mubr.f32.vlgmr.msra.gmra.mrb[2].mxu0 %v308_v33 }
  0x6e   : > { %2934 = vmatpush3.bf16.msra.mxu0 %v2931_v50  ;;  %2758 = vmatprep.mubr.msk.f32.mxu0 %vm220_vm0, %v3255_v10 }
  0x6f   : > { %2936 = vmatprep.subr.bf16.mxu0 %v2935_v51 }
  0x75   : > { %2759 = vmatmul.mubr.msk.f32.vlgmr.msra.gmra.mrb[2].mxu0 %vm220_vm0, %v3266_v15 }
  0x76   : > { %2938 = vmatpush3.bf16.msra.mxu0 %v2935_v51  ;;  %2765 = vmatprep.mubr.f32.mxu0 %v3263_v14 }
  0x77   : > { %2940 = vmatprep.subr.bf16.mxu0 %v2927_v45 }
  0x7d   : > { %2766 = vmatmul.mubr.f32.vlgmr.msra.gmra.mrb[2].mxu0 %v3284_v22  ;;  %v3384_v22 = vpack.c.bf16 %v835_v63, %v828_v62 }
  0x7e   : > { %2942 = vmatpush3.bf16.msra.mxu0 %v2927_v45  ;;  %2772 = vmatprep.mubr.f32.mxu0 %v3282_v21  ;;  %v3382_v21 = vpack.c.bf16 %v848_v6, %v841_v5 }
  0x7f   : > { %2944 = vmatprep.subr.bf16.mxu0 %v2943_v52 }
  0x85   : > { %2773 = vmatmul.mubr.f32.vlgmr.msra.gmra.mrb[2].mxu0 %v3289_v26 }
  0x86   : > { %2946 = vmatpush3.bf16.msra.mxu0 %v2943_v52  ;;  %2779 = vmatprep.mubr.msk.f32.mxu0 %vm220_vm0, %v3255_v10 }
  0x87   : > { %2948 = vmatprep.subr.bf16.mxu0 %v2927_v45 }
  0x8d   : > { %2780 = vmatmul.mubr.msk.f32.vlgmr.msra.gmra.mrb[2].mxu0 %vm220_vm0, %v3266_v15 }
  0x8e   : > { %2950 = vmatpush3.bf16.msra.mxu0 %v2927_v45  ;;  %2786 = vmatprep.mubr.msk.f32.mxu0 %vm220_vm0, %v3255_v10  ;;  %v830_v10 = vand.u32 4294901760, %v829_v1 }
  0x8f   : > { %2976 = vmatprep.subr.msk.bf16.mxu0 %vm3275_vm5, %v3133_v61 }
  0x90   : > { %v3375_v14 = vpack.c.bf16 %v837_v11, %v830_v10 }
  0x92   : > { %2888 = vmatprep.subr.bf16.mxu1 %v3375_v14 }
  0x95   : > { %2787 = vmatmul.mubr.msk.f32.vlgmr.msra.gmra.mrb[2].mxu0 %vm220_vm0, %v3266_v15  ;;  %v850_v15 = vsub.f32 %v848_v6, %v849_v13 }
  0x96   : > { %2978 = vmatpush3.bf16.msk.msra.mxu0 %vm3275_vm5, %v3133_v61 }
  0x97   : > { %2980 = vmatprep.subr.msk.bf16.mxu0 %vm3354_vm8, %v3133_v61  ;;  %v851_v17 = vand.u32 4294901760, %v850_v15 }
  0x99   : > { %v3378_v19 = vpack.c.bf16 %v851_v17, %v844_v16 }
  0x9a   : > { %2982 = vmatpush3.bf16.msk.msra.mxu0 %vm3354_vm8, %v3133_v61 }
  0x9b   : > { %2984 = vmatprep.subr.bf16.mxu0 %v3384_v22 }
  0xbe   : > { %v2313_v10 = vpop.permute.xlu0 %2312 }
 0x13c   : > { %v2680_v26 = vpop.f32.mrb[0].mxu0 }
 0x13d   : > { %v734_v27 = vsel %vm729_vm9, %v2680_v26, 0  ;;  %v719_v28 = vpop.f32.mrb[1].mxu0 }
 0x13e   : > { %v815_v29 = vand.u32 4294901760, %v734_v27  ;;  %v731_v30 = vsel %vm729_vm9, %v719_v28, 0 }
 0x13f   : > { %v805_v31 = vand.u32 4294901760, %v731_v30 }
 0x140   : > { %v816_v32 = vsub.f32 %v734_v27, %v815_v29 }
 0x141   : > { %v806_v33 = vsub.f32 %v731_v30, %v805_v31 }
 0x142   : > { %v817_v34 = vand.u32 4294901760, %v816_v32 }
 0x143   : > { %v807_v35 = vand.u32 4294901760, %v806_v33 }
 0x144   : > { %v818_v36 = vsub.f32 %v816_v32, %v817_v34 }
 0x145   : > { %v808_v39 = vsub.f32 %v806_v33, %v807_v35 }
 0x146   : > { %v819_v41 = vand.u32 4294901760, %v818_v36 }
 0x147   : > { %v809_v40 = vand.u32 4294901760, %v808_v39 }
 0x149   : > { %2689 = vmatprep.mubr.f32.mxu1 %v809_v40 }
 0x14a   : > { %2690 = vmatmul.mubr.f32.vlgmr.msra.gmra.mrb[0].mxu1 %v819_v41 }
 0x14b   : > { %2890 = vmatpush3.bf16.msra.mxu1 %v3375_v14  ;;  %2700 = vmatprep.mubr.f32.mxu1 %v805_v31 }
 0x14c   : > { %2892 = vmatprep.subr.bf16.mxu1 %v3378_v19 }
 0x14f   : > { %2894 = vmatpush3.bf16.msra.mxu1 %v3378_v19 }
 0x150   : > { %2896 = vmatprep.subr.bf16.mxu1 %v3380_v20 }
 0x152   : > { %2701 = vmatmul.mubr.f32.vlgmr.msra.gmra.mrb[0].mxu1 %v815_v29 }
 0x153   : > { %2898 = vmatpush3.bf16.msra.mxu1 %v3380_v20  ;;  %2711 = vmatprep.mubr.f32.mxu1 %v806_v33 }
 0x154   : > { %2900 = vmatprep.subr.bf16.mxu1 %v3382_v21 }
 0x157   : > { %2902 = vmatpush3.bf16.msra.mxu1 %v3382_v21 }
 0x158   : > { %2904 = vmatprep.subr.msk.bf16.mxu1 %vm3275_vm5, %v3133_v61 }
 0x15a   : > { %2712 = vmatmul.mubr.f32.vlgmr.msra.gmra.mrb[0].mxu1 %v816_v32 }
 0x15b   : > { %2906 = vmatpush3.bf16.msk.msra.mxu1 %vm3275_vm5, %v3133_v61  ;;  %2722 = vmatprep.mubr.f32.mxu1 %v807_v35 }
 0x15c   : > { %2908 = vmatprep.subr.msk.bf16.mxu1 %vm3354_vm8, %v3133_v61 }
 0x15f   : > { %2910 = vmatpush3.bf16.msk.msra.mxu1 %vm3354_vm8, %v3133_v61 }
 0x160   : > { %2912 = vmatprep.subr.bf16.mxu1 %v3384_v22 }
 0x162   : > { %2723 = vmatmul.mubr.f32.vlgmr.msra.gmra.mrb[0].mxu1 %v817_v34 }
 0x163   : > { %2914 = vmatpush3.bf16.msra.mxu1 %v3384_v22  ;;  %2733 = vmatprep.mubr.f32.mxu1 %v805_v31 }
 0x164   : > { %2916 = vmatprep.subr.bf16.mxu1 %v3387_v23 }
 0x167   : > { %2918 = vmatpush3.bf16.msra.mxu1 %v3387_v23 }
 0x168   : > { %v2788_v42 = vpop.f32.mrb[2].mxu0  ;;  %2920 = vmatprep.subr.msk.bf16.mxu1 %vm3275_vm5, %v3133_v61 }
 0x169   : > { %v1770_v43 = vsel %vm729_vm9, %v2788_v42, 0  ;;  %v1756_v44 = vpop.f32.mrb[3].mxu0 }
 0x16a   : > { %v1851_v45 = vand.u32 4294901760, %v1770_v43  ;;  %v1767_v46 = vsel %vm729_vm9, %v1756_v44, 0  ;;  %2734 = vmatmul.mubr.f32.vlgmr.msra.gmra.mrb[0].mxu1 %v815_v29 }
 0x16b   : > { %v1841_v47 = vand.u32 4294901760, %v1767_v46  ;;  %2922 = vmatpush3.bf16.msk.msra.mxu1 %vm3275_vm5, %v3133_v61  ;;  %2744 = vmatprep.mubr.f32.mxu1 %v805_v31 }
 0x16c   : > { %v1852_v48 = vsub.f32 %v1770_v43, %v1851_v45  ;;  %2924 = vmatprep.subr.msk.bf16.mxu1 %vm3354_vm8, %v3133_v61 }
 0x16d   : > { %v1842_v49 = vsub.f32 %v1767_v46, %v1841_v47 }
 0x16e   : > { %v1853_v51 = vand.u32 4294901760, %v1852_v48 }
 0x16f   : > { %2926 = vmatpush3.bf16.msk.msra.mxu1 %vm3354_vm8, %v3133_v61  ;;  %v1843_v50 = vand.u32 4294901760, %v1842_v49 }
 0x170   : > { %2952 = vmatprep.subr.msk.bf16.mxu1 %vm3275_vm5, %v3133_v61  ;;  %v1854_v54 = vsub.f32 %v1852_v48, %v1853_v51 }
 0x171   : > { %2830 = vmatprep.mubr.f32.mxu0 %v1843_v50  ;;  %v1844_v52 = vsub.f32 %v1842_v49, %v1843_v50 }
 0x172   : > { %2745 = vmatmul.mubr.f32.vlgmr.msra.gmra.mrb[0].mxu1 %v815_v29  ;;  %2831 = vmatmul.mubr.f32.vlgmr.msra.gmra.mrb[4].mxu0 %v1853_v51  ;;  %v1855_v55 = vand.u32 4294901760, %v1854_v54 }
 0x173   : > { %2954 = vmatpush3.bf16.msk.msra.mxu1 %vm3275_vm5, %v3133_v61  ;;  %2986 = vmatpush3.bf16.msra.mxu0 %v3384_v22  ;;  %v1845_v53 = vand.u32 4294901760, %v1844_v52 }
 0x174   : > { %2841 = vmatprep.mubr.f32.mxu0 %v1841_v47  ;;  %2956 = vmatprep.subr.msk.bf16.mxu1 %vm3354_vm8, %v3133_v61 }
 0x175   : > { %2797 = vmatprep.mubr.f32.mxu1 %v1845_v53  ;;  %2988 = vmatprep.subr.bf16.mxu0 %v3387_v23 }
 0x177   : > { %2958 = vmatpush3.bf16.msk.msra.mxu1 %vm3354_vm8, %v3133_v61  ;;  %2990 = vmatpush3.bf16.msra.mxu0 %v3387_v23 }
 0x178   : > { %2960 = vmatprep.subr.bf16.mxu1 %v3375_v14  ;;  %2992 = vmatprep.subr.msk.bf16.mxu0 %vm3275_vm5, %v3133_v61 }
 0x17a   : > { %2798 = vmatmul.mubr.f32.vlgmr.msra.gmra.mrb[2].mxu1 %v1855_v55  ;;  %2842 = vmatmul.mubr.f32.vlgmr.msra.gmra.mrb[4].mxu0 %v1851_v45 }
 0x17b   : > { %2962 = vmatpush3.bf16.msra.mxu1 %v3375_v14  ;;  %2808 = vmatprep.mubr.f32.mxu1 %v1841_v47 }
 0x17c   : > { %2994 = vmatpush3.bf16.msk.msra.mxu0 %vm3275_vm5, %v3133_v61  ;;  %2852 = vmatprep.mubr.f32.mxu0 %v1841_v47 }
 0x17d   : > { %2964 = vmatprep.subr.bf16.mxu1 %v3378_v19  ;;  %2996 = vmatprep.subr.msk.bf16.mxu0 %vm3354_vm8, %v3133_v61 }
 0x17f   : > { %2966 = vmatpush3.bf16.msra.mxu1 %v3378_v19 }
 0x180   : > { %2998 = vmatpush3.bf16.msk.msra.mxu0 %vm3354_vm8, %v3133_v61  ;;  %2968 = vmatprep.subr.bf16.mxu1 %v3380_v20 }
 0x182   : > { %2809 = vmatmul.mubr.f32.vlgmr.msra.gmra.mrb[2].mxu1 %v1851_v45 }
 0x183   : > { %2970 = vmatpush3.bf16.msra.mxu1 %v3380_v20  ;;  %2819 = vmatprep.mubr.f32.mxu1 %v1842_v49 }
 0x184   : > { %2853 = vmatmul.mubr.f32.vlgmr.msra.gmra.mrb[4].mxu0 %v1851_v45  ;;  %2972 = vmatprep.subr.bf16.mxu1 %v3382_v21 }
 0x187   : > { %2974 = vmatpush3.bf16.msra.mxu1 %v3382_v21 }
 0x18a   : > { %2820 = vmatmul.mubr.f32.vlgmr.msra.gmra.mrb[2].mxu1 %v1852_v48 }
 0x245   : > { %v2746_v18 = vpop.f32.mrb[0].mxu1 }
 0x246   : > { %v1254_v56 = vpop.f32.mrb[1].mxu1  ;;  %v2301_v63 = vmul.f32 %v2746_v18, %v3252_v8  ;;  %v2320_v0 = vmul.f32 %v2746_v18, %v3302_v38 }
 0x247   : > { %v2300_v3 = vmul.f32 %v1254_v56, %v3249_v7  ;;  %v2319_v4 = vmul.f32 %v3299_v37, %v1254_v56 }
 0x257   : > { %v2854_v57 = vpop.f32.mrb[4].mxu0 }
 0x258   : > { %v2290_v58 = vpop.f32.mrb[5].mxu0 }
 0x25d   : > { %v2821_v59 = vpop.f32.mrb[2].mxu1 }
 0x25e   : > { %v2999_v60 = vadd.f32 %v2854_v57, %v2821_v59  ;;  %v2034_v62 = vpop.f32.mrb[3].mxu1 }
 0x25f   : > { %v3000_v61 = vadd.f32 %v2290_v58, %v2034_v62 }
 0x260   : > { %v2303_v1 = vmul.f32 %v2999_v60, %v3302_v38  ;;  %v2318_v2 = vmul.f32 %v2999_v60, %v3252_v8 }
 0x261   : > { %v2302_v5 = vmul.f32 %v3000_v61, %v3299_v37  ;;  %v2317_v6 = vmul.f32 %v3000_v61, %v3249_v7 }
 0x262   : > { %v2305_v11 = vsub.f32 %v2301_v63, %v2303_v1  ;;  %v2322_v12 = vsub.f32 %v2318_v2, %v2320_v0 }
 0x263   : > { %v2304_v13 = vsub.f32 %v2300_v3, %v2302_v5  ;;  %v2321_v14 = vsub.f32 %v2317_v6, %v2319_v4 }
 0x264   : > { %v2316_v9 = vmul.f32 %v2313_v10, %v2305_v11  ;;  %v2324_v15 = vmul.f32 %v2322_v12, %v2313_v10 }
 0x265   : > { %v2315_v16 = vmul.f32 %v2313_v10, %v2304_v13  ;;  %v2323_v38 = vmul.f32 %v2321_v14, %v2313_v10  ;;  %2344 = sbr.rel (!%p3197_p8) target bundleno = 628 (0x274), region = 36 }
 0x266   : > { %v2326_v17 = vmul.f32 %v2316_v9, %v3252_v8  ;;  %v2328_v19 = vmul.f32 %v2324_v15, %v3252_v8 }
 0x267   : > { %v2325_v20 = vmul.f32 %v2315_v16, %v3249_v7  ;;  %v2327_v37 = vmul.f32 %v2323_v38, %v3249_v7 }
 0x268   : > { %v2330_v21 = vsub.f32 %v2326_v17, %v2328_v19  ;;  %v2334_v22 = vadd.f32 %v2328_v19, %v2326_v17 }
 0x269   : > { %v2329_v23 = vsub.f32 %v2325_v20, %v2327_v37  ;;  %v2333_v24 = vadd.f32 %v2327_v37, %v2325_v20 }
 0x26a   : > { %2332 = vst.msk [vmem:[%s184_s14 + $0x8] sm:$0xff] %vm729_vm9, %v2330_v21  ;;  %2511 = vst.msk [vmem:[%s184_s14 + $0x18] sm:$0xff] %vm729_vm9, %v2334_v22 }
 0x26b   : > { %2331 = vst.msk [vmem:[%s184_s14] sm:$0xff] %vm729_vm9, %v2329_v23  ;;  %2510 = vst.msk [vmem:[%s184_s14 + $0x10] sm:$0xff] %vm729_vm9, %v2333_v24 }
 0x271   : > { %v2383_v7 = vld [vmem:[%s184_s14 + $0x8] sm:$0xff]  ;;  %v2387_v26 = vld [vmem:[%s184_s14 + $0x18] sm:$0xff] }
 0x272   : > { %v2381_v8 = vld [vmem:[%s184_s14] sm:$0xff]  ;;  %v2385_v25 = vld [vmem:[%s184_s14 + $0x10] sm:$0xff]  ;;  %2384 = vst [vmem:[%s2347_s26 + $0x8] sm:$0xff] %v2383_v7  ;;  %2388 = vst [vmem:[%s2347_s26 + $0x28] sm:$0xff] %v2387_v26 }
 0x273   : > { %2382 = vst [vmem:[%s2347_s26] sm:$0xff] %v2381_v8  ;;  %2386 = vst [vmem:[%s2347_s26 + $0x20] sm:$0xff] %v2385_v25 }
 0x274 PF: > { %p14_p13 = scmp.ge.s32.totalorder %s3175_s15, 4   ;;  %s3509_s11 = smov %s3116_s12 }
 0x275   : > { %s3510_s12 = smov %s3120_s13  ;;  %s3511_s13 = smov %s3185_s18 }
 0x276   : > { %s3512_s14 = smov %s3175_s15  ;;  %16 = sbr.rel (!%p14_p13) target bundleno = 6 (0x6), region = 113 }
 0x27d   :  { %2404 = vsyncpa [#allocation4], 1 }
 0x27e   :  { %2406 = vsyncpa [#allocation4 + $0x1], 1 }

</bundles_post_ra>
